<compile_context>
chip_gen: v5e
topology: v5e:2x2
jax: 0.10.0
libtpu: 0.0.40
codegen_flags: <defaults>
</compile_context>

<pallas_src>
import jax
import jax.numpy as jnp
from jax.experimental import pallas as pl
from jax.experimental.pallas import tpu as pltpu

ELEMENT_SIZE = 4
CHANNEL = 8
L_N = 16
C_N = 16
EMBED = ELEMENT_SIZE * ELEMENT_SIZE * CHANNEL      # 128
N_DICT = L_N * C_N                                 # 256


# ----------------------------------------------------------------------------
# Chip-aware trace-time switches (safe defaults if detection fails).
# ----------------------------------------------------------------------------
def _device_kind():
    try:
        return jax.devices()[0].device_kind.lower()
    except Exception:
        return ""


_KIND = _device_kind()
# v7x (and v4 / v5p megacore) expose 2 TensorCores per chip; v5e / v6e are
# single-TC, where extra grid steps are pure per-step overhead.
_MIN_GRID_STEPS = 2 if any(t in _KIND for t in ("v7", "v4", "v5p")) else 1
# bf16 EUP exp is only available / a win on v6e and v7x (not v5e).
_EXP_BF16 = ("v6" in _KIND) or ("v7" in _KIND)


# ----------------------------------------------------------------------------
# Unfold / Fold helpers (stride == kernel_size -> pure reshape/transpose glue)
# ----------------------------------------------------------------------------
def unfold_patches(x):
    """x: (B, C, H, W) NCHW -> (B, L, C*k*k); patch order row-major, value
    order (c, kh, kw) to match nn.Unfold."""
    B, C, H, W = x.shape
    k = ELEMENT_SIZE
    hp, wp = H // k, W // k
    x = x.reshape(B, C, hp, k, wp, k)
    x = jnp.transpose(x, (0, 2, 4, 1, 3, 5))        # (B, hp, wp, C, k, k)
    return x.reshape(B, hp * wp, C * k * k)


def fold_patches(p, H, W):
    """p: (B, L, C*k*k) -> (B, C, H, W); inverse of unfold_patches
    (matches nn.Fold for non-overlapping patches)."""
    B, L, E = p.shape
    k = ELEMENT_SIZE
    C = E // (k * k)
    hp, wp = H // k, W // k
    p = p.reshape(B, hp, wp, C, k, k)
    p = jnp.transpose(p, (0, 3, 1, 4, 2, 5))         # (B, C, hp, k, wp, k)
    return p.reshape(B, C, H, W)


# ----------------------------------------------------------------------------
# Pallas kernel: single-head cross-attention of flattened patch rows against
# the (pre-folded) Dictionary keys/values.  Two MXU matmuls per tile.
# ----------------------------------------------------------------------------
def _make_attn_kernel(exp_bf16):
    def _attn_kernel(x_ref, a_ref, ba_ref, vp_ref, bo_ref, out_ref):
        # x_ref : (Mt, E) bf16   flattened (batch*patch) rows
        # a_ref : (E, N)  bf16   (Wq^T/sqrt(E)) @ K^T      (batch-invariant)
        # ba_ref: (1, N)  f32    (bq/sqrt(E)) @ K^T
        # vp_ref: (N, E)  bf16   V @ Wo^T                  (batch-invariant)
        # bo_ref: (1, E)  f32
        scores = jnp.dot(x_ref[...], a_ref[...],
                         preferred_element_type=jnp.float32) + ba_ref[...]   # (Mt, N)

        # Numerically-stable softmax; normalization deferred past the PV matmul
        # (applied to the (Mt, E) ctx instead of the (Mt, N) probabilities).
        m = jnp.max(scores, axis=-1, keepdims=True)
        z = scores - m
        if exp_bf16:
            # v6e/v7x: packed-bf16 EUP exp; denominator accumulated in f32.
            p = jnp.exp(z.astype(jnp.bfloat16))                              # (Mt, N) bf16
            denom = jnp.sum(p.astype(jnp.float32), axis=-1, keepdims=True)   # (Mt, 1) f32
        else:
            p_f32 = jnp.exp(z)
            denom = jnp.sum(p_f32, axis=-1, keepdims=True)
            p = p_f32.astype(jnp.bfloat16)

        ctx = jnp.dot(p, vp_ref[...],
                      preferred_element_type=jnp.float32)                    # (Mt, E)
        out = ctx * pl.reciprocal(denom, approx=False) + bo_ref[...]
        out_ref[...] = out.astype(out_ref.dtype)

    return _attn_kernel


def _pick_m_tile(M, min_steps):
    """Largest lane/sublane-friendly row tile.  min_steps >= 2 only on
    multi-TensorCore chips so both cores get work; on single-TC chips the
    grid is a serial loop and fewer, fatter steps win."""
    candidates = (2048, 1024, 512, 256, 128, 64, 32, 16)
    for t in candidates:
        if M % t == 0 and M // t >= min_steps:
            return t
    for t in candidates:
        if M % t == 0:
            return t
    return M


def dictionary_attention(x_flat, A, bA, Vp, bo):
    """x_flat: (M, E) bf16; A: (E, N) bf16; bA: (1, N) f32; Vp: (N, E) bf16;
    bo: (1, E) f32.  Returns bf16 attention output (M, E)."""
    M, E = x_flat.shape
    N = A.shape[1]
    Mt = _pick_m_tile(M, _MIN_GRID_STEPS)
    # bf16 tiles pack 16 rows per sublane group; guard the block shape.
    assert Mt == M or Mt % 16 == 0, f"M-tile {Mt} must be a multiple of 16"

    const = lambda i: (0, 0)
    kernel = _make_attn_kernel(_EXP_BF16)

    cost = pl.CostEstimate(
        flops=4 * M * E * N,                 # two (M,E,N)-ish matmuls
        transcendentals=M * N,               # exp
        bytes_accessed=2 * (M * E * 2)       # x in + out, both bf16
        + 2 * (E * N * 2)                    # A + Vp (bf16 constants)
        + (N + E) * 4,                       # bA + bo (f32)
    )

    return pl.pallas_call(
        kernel,
        out_shape=jax.ShapeDtypeStruct((M, E), jnp.bfloat16),
        grid_spec=pltpu.PrefetchScalarGridSpec(
            num_scalar_prefetch=0,
            grid=(M // Mt,),
            in_specs=[
                pl.BlockSpec((Mt, E), lambda i: (i, 0)),   # x rows per tile
                pl.BlockSpec((E, N), const),               # A  = WqT_s @ K^T
                pl.BlockSpec((1, N), const),               # bA = bq_s @ K^T
                pl.BlockSpec((N, E), const),               # V' = V @ Wo^T
                pl.BlockSpec((1, E), const),               # bo
            ],
            out_specs=pl.BlockSpec((Mt, E), lambda i: (i, 0)),
        ),
        compiler_params=pltpu.CompilerParams(
            dimension_semantics=("parallel",)),
        cost_estimate=cost,
    )(x_flat, A, bA, Vp, bo)


# ----------------------------------------------------------------------------
# Module forward
# ----------------------------------------------------------------------------
def make_params(key):
    ks = jax.random.split(key, 6)
    dictionary = jax.random.uniform(ks[0], (N_DICT, 1, EMBED), jnp.float32, 0.0, 1.0)
    # in_proj_weight: xavier_uniform over (3E, E); biases zero (PyTorch MHA default)
    bound = jnp.sqrt(6.0 / (EMBED + EMBED))
    wq = jax.random.uniform(ks[1], (EMBED, EMBED), jnp.float32, -bound, bound)
    wk = jax.random.uniform(ks[2], (EMBED, EMBED), jnp.float32, -bound, bound)
    wv = jax.random.uniform(ks[3], (EMBED, EMBED), jnp.float32, -bound, bound)
    wo = jax.random.uniform(ks[4], (EMBED, EMBED), jnp.float32, -bound, bound)
    bq = jnp.zeros((EMBED,), jnp.float32)
    bk = jnp.zeros((EMBED,), jnp.float32)
    bv = jnp.zeros((EMBED,), jnp.float32)
    bo = jnp.zeros((EMBED,), jnp.float32)
    return dict(dictionary=dictionary, wq=wq, wk=wk, wv=wv, wo=wo,
                bq=bq, bk=bk, bv=bv, bo=bo)


@jax.jit
def forward(params, x):
    """x: (B, 8, H, W) NCHW with H == W in {16, 64}.
    Returns (representation (B, 8, H, W) f32, visible_D (1, 8, 64, 64) f32)."""
    B, C, H, W = x.shape
    d2 = params["dictionary"][:, 0, :]                         # (N, E), batch-invariant
    scale = 1.0 / jnp.sqrt(jnp.float32(EMBED))

    # Hoisted, fused K/V projection of the Dictionary (once, outside the grid).
    wkvT = jnp.concatenate([params["wk"].T, params["wv"].T], axis=1)     # (E, 2E)
    bkv = jnp.concatenate([params["bk"], params["bv"]])                  # (2E,)
    kv = d2 @ wkvT + bkv                                                 # (N, 2E)
    k = kv[:, :EMBED]                                                    # (N, E)
    v = kv[:, EMBED:]                                                    # (N, E)

    # Fold the remaining batch-invariant weight chains into the kernel constants:
    #   scores = x @ A + bA ;  out = softmax(scores) @ V' + bo
    wqT_s = params["wq"].T * scale                                       # (E, E)
    A = (wqT_s @ k.T).astype(jnp.bfloat16)                               # (E, N)
    bA = ((params["bq"] * scale) @ k.T).reshape(1, N_DICT).astype(jnp.float32)
    Vp = (v @ params["wo"].T).astype(jnp.bfloat16)                       # (N, E)
    bo = params["bo"].reshape(1, EMBED).astype(jnp.float32)

    # Flatten batch into the matmul M axis: all rows attend to the same Dictionary.
    x_w = unfold_patches(x)                                    # (B, L, E)
    L = x_w.shape[1]
    x_flat = x_w.reshape(B * L, EMBED).astype(jnp.bfloat16)    # (M, E)

    a = dictionary_attention(x_flat, A, bA, Vp, bo)            # (M, E) bf16
    representation = fold_patches(
        a.reshape(B, L, EMBED), H, W).astype(jnp.float32)      # (B, C, H, W)

    # visible_D = Fold(Dictionary.permute(1,2,0)) -> (1, 8, 64, 64)
    visible_D = fold_patches(d2[None, :, :],
                             L_N * ELEMENT_SIZE, C_N * ELEMENT_SIZE)
    return representation, visible_D


# Pure-JAX f32 reference of the attention hot path (verification only).
def _attn_reference(x_w, d2, p):
    q = x_w @ p["wq"].T + p["bq"]
    k = d2 @ p["wk"].T + p["bk"]
    v = d2 @ p["wv"].T + p["bv"]
    scores = (q / jnp.sqrt(jnp.float32(EMBED))) @ k.T          # (B, L, N)
    attn = jax.nn.softmax(scores, axis=-1)
    ctx = attn @ v
    return ctx @ p["wo"].T + p["bo"]


if __name__ == "__main__":
    key = jax.random.PRNGKey(0)
    pkey, xkey = jax.random.split(key)
    params = make_params(pkey)

    # Small input consistent with the module: (B, channel=8, 16, 16) -> L = 16 patches.
    x = jax.random.normal(xkey, (2, CHANNEL, 16, 16), jnp.float32)

    representation, visible_D = forward(params, x)
    jax.block_until_ready((representation, visible_D))

    assert representation.shape == (2, CHANNEL, 16, 16)
    assert visible_D.shape == (1, CHANNEL, 64, 64)

    # Cross-check the kernel against a plain-JAX f32 reference (tolerance loosened
    # for the bf16 MXU operands / bf16 output).
    a_ref = _attn_reference(unfold_patches(x), params["dictionary"][:, 0, :], params)
    rep_ref = fold_patches(a_ref, 16, 16)
    assert jnp.allclose(representation, rep_ref, atol=5e-2, rtol=5e-2), (
        float(jnp.max(jnp.abs(representation - rep_ref))))

    print("KERNEL_OK")
</pallas_src>

<mosaic_0001>
module attributes {stable_mosaic.version = 11 : i64} {
  func.func @_attn_kernel(%arg0: i32, %arg1: memref<32x128xbf16, #tpu.memory_space<vmem>>, %arg2: memref<128x256xbf16, #tpu.memory_space<vmem>>, %arg3: memref<1x256xf32, #tpu.memory_space<vmem>>, %arg4: memref<256x128xbf16, #tpu.memory_space<vmem>>, %arg5: memref<1x128xf32, #tpu.memory_space<vmem>>, %arg6: memref<32x128xbf16, #tpu.memory_space<vmem>>) attributes {dimension_semantics = [#tpu.dimension_semantics<parallel>], iteration_bounds = array<i64: 1>, scalar_prefetch = 0 : i64, scratch_operands = 0 : i64, tpu.core_type = #tpu.core_type<tc>, window_params = [{transform_indices = @transform_0, window_bounds = array<i64: 32, 128>}, {pipeline_mode = #tpu.pipeline_mode<synchronous>, transform_indices = @transform_1, window_bounds = array<i64: 128, 256>}, {pipeline_mode = #tpu.pipeline_mode<synchronous>, transform_indices = @transform_2, window_bounds = array<i64: 1, 256>}, {pipeline_mode = #tpu.pipeline_mode<synchronous>, transform_indices = @transform_3, window_bounds = array<i64: 256, 128>}, {pipeline_mode = #tpu.pipeline_mode<synchronous>, transform_indices = @transform_4, window_bounds = array<i64: 1, 128>}, {transform_indices = @transform_5, window_bounds = array<i64: 32, 128>}]} {
    %c0 = arith.constant 0 : index
    %c0_0 = arith.constant 0 : index
    %0 = vector.load %arg1[%c0, %c0_0] : memref<32x128xbf16, #tpu.memory_space<vmem>>, vector<32x128xbf16>
    %c0_1 = arith.constant 0 : index
    %c0_2 = arith.constant 0 : index
    %1 = vector.load %arg2[%c0_1, %c0_2] : memref<128x256xbf16, #tpu.memory_space<vmem>>, vector<128x256xbf16>
    %cst = arith.constant dense<0.000000e+00> : vector<32x256xf32>
    %2 = tpu.matmul %0, %1, %cst {dimension_numbers = #tpu.dot_dimension_numbers<[1], [0], [0], [1], [0, 0, 1, 1], [], []>} : vector<32x128xbf16>, vector<128x256xbf16>, vector<32x256xf32> -> vector<32x256xf32>
    %c0_3 = arith.constant 0 : index
    %c0_4 = arith.constant 0 : index
    %3 = vector.load %arg3[%c0_3, %c0_4] : memref<1x256xf32, #tpu.memory_space<vmem>>, vector<1x256xf32>
    %4 = vector.broadcast %3 : vector<1x256xf32> to vector<32x256xf32>
    %5 = arith.addf %2, %4 : vector<32x256xf32>
    %cst_5 = arith.constant dense<0xFF800000> : vector<32xf32>
    %6 = vector.multi_reduction <maximumf>, %5, %cst_5 [1] : vector<32x256xf32> to vector<32xf32>
    %7 = vector.shape_cast %6 : vector<32xf32> to vector<32x1xf32>
    %8 = vector.broadcast %7 : vector<32x1xf32> to vector<32x256xf32>
    %9 = arith.subf %5, %8 : vector<32x256xf32>
    %10 = math.exp %9 : vector<32x256xf32>
    %cst_6 = arith.constant dense<0.000000e+00> : vector<32xf32>
    %11 = vector.multi_reduction <add>, %10, %cst_6 [1] : vector<32x256xf32> to vector<32xf32>
    %12 = vector.shape_cast %11 : vector<32xf32> to vector<32x1xf32>
    %13 = arith.truncf %10 : vector<32x256xf32> to vector<32x256xbf16>
    %c0_7 = arith.constant 0 : index
    %c0_8 = arith.constant 0 : index
    %14 = vector.load %arg4[%c0_7, %c0_8] : memref<256x128xbf16, #tpu.memory_space<vmem>>, vector<256x128xbf16>
    %cst_9 = arith.constant dense<0.000000e+00> : vector<32x128xf32>
    %15 = tpu.matmul %13, %14, %cst_9 {dimension_numbers = #tpu.dot_dimension_numbers<[1], [0], [0], [1], [0, 0, 1, 1], [], []>} : vector<32x256xbf16>, vector<256x128xbf16>, vector<32x128xf32> -> vector<32x128xf32>
    %16 = tpu.reciprocal %12 : vector<32x1xf32> -> vector<32x1xf32>
    %17 = vector.broadcast %16 : vector<32x1xf32> to vector<32x128xf32>
    %18 = arith.mulf %15, %17 : vector<32x128xf32>
    %c0_10 = arith.constant 0 : index
    %c0_11 = arith.constant 0 : index
    %19 = vector.load %arg5[%c0_10, %c0_11] : memref<1x128xf32, #tpu.memory_space<vmem>>, vector<1x128xf32>
    %20 = vector.broadcast %19 : vector<1x128xf32> to vector<32x128xf32>
    %21 = arith.addf %18, %20 : vector<32x128xf32>
    %22 = arith.truncf %21 : vector<32x128xf32> to vector<32x128xbf16>
    %c0_12 = arith.constant 0 : index
    %c0_13 = arith.constant 0 : index
    %23 = vector.load %arg6[%c0_12, %c0_13] : memref<32x128xbf16, #tpu.memory_space<vmem>>, vector<32x128xbf16>
    tpu.vector_store %arg6[%c0_12, %c0_13], %22 {strides = array<i32>} : memref<32x128xbf16, #tpu.memory_space<vmem>>, vector<32x128xbf16>,
    return
  }
  func.func @transform_0(%arg0: i32) -> (i32, i32) {
    %c0_i32 = arith.constant 0 : i32
    %c0_i32_0 = arith.constant 0 : i32
    return %arg0, %c0_i32 : i32, i32
  }
  func.func @transform_1(%arg0: i32) -> (i32, i32) {
    %c0_i32 = arith.constant 0 : i32
    %c0_i32_0 = arith.constant 0 : i32
    %c0_i32_1 = arith.constant 0 : i32
    return %c0_i32, %c0_i32_0 : i32, i32
  }
  func.func @transform_2(%arg0: i32) -> (i32, i32) {
    %c0_i32 = arith.constant 0 : i32
    %c0_i32_0 = arith.constant 0 : i32
    %c0_i32_1 = arith.constant 0 : i32
    return %c0_i32, %c0_i32_0 : i32, i32
  }
  func.func @transform_3(%arg0: i32) -> (i32, i32) {
    %c0_i32 = arith.constant 0 : i32
    %c0_i32_0 = arith.constant 0 : i32
    %c0_i32_1 = arith.constant 0 : i32
    return %c0_i32, %c0_i32_0 : i32, i32
  }
  func.func @transform_4(%arg0: i32) -> (i32, i32) {
    %c0_i32 = arith.constant 0 : i32
    %c0_i32_0 = arith.constant 0 : i32
    %c0_i32_1 = arith.constant 0 : i32
    return %c0_i32, %c0_i32_0 : i32, i32
  }
  func.func @transform_5(%arg0: i32) -> (i32, i32) {
    %c0_i32 = arith.constant 0 : i32
    %c0_i32_0 = arith.constant 0 : i32
    return %arg0, %c0_i32 : i32, i32
  }
}

</mosaic_0001>

<bundles_post_ra>
// kernel: forward.1
= control target key start
LH: loop header
LB: loop body
LE: loop exit
PB: predicated region body
PF: predicated region fallthrough
CT: control target
= control target key end

     0   :  { %s892_s1 = inlined_call_operand.vmem [shape: bf16[128,256], index: 1, kind: input, shape index: {}]   ;;  %s893_s0 = inlined_call_operand.vmem [shape: bf16[32,128], index: 0, kind: input, shape index: {}]   ;;  %s894_s2 = inlined_call_operand.vmem [shape: f32[1,256], index: 2, kind: input, shape index: {}]   ;;  %s895_s3 = inlined_call_operand.vmem [shape: bf16[256,128], index: 3, kind: input, shape index: {}]   ;;  %s896_s4 = inlined_call_operand.vmem [shape: f32[1,128], index: 4, kind: input, shape index: {}]   ;;  %s897_s5 = inlined_call_operand.vmem [shape: bf16[32,128], index: 5, kind: output, shape index: {}]  }
   0x1   :  { %v540_v0 = vld [vmem:[%s892_s1 + $0x70] sm:$0xf]  ;;  %v627_v1 = vld [vmem:[%s892_s1 + $0x74] sm:$0xf0]  ;;  %v626_v2 = vld [vmem:[%s892_s1 + $0x74] sm:$0xf] }
   0x2   :  { %v541_v3 = vor.u32 %v627_v1, %v540_v0  ;;  %v542_v4 = vld [vmem:[%s892_s1 + $0x78] sm:$0xf0]  ;;  %v532_v5 = vld [vmem:[%s892_s1 + $0x60] sm:$0xf]  ;;  %v625_v6 = vld [vmem:[%s892_s1 + $0x64] sm:$0xf0] }
   0x3   :  { %v545_v7 = vor.u32 %v626_v2, %v542_v4  ;;  %v624_v8 = vld [vmem:[%s892_s1 + $0x64] sm:$0xf]  ;;  %v534_v9 = vld [vmem:[%s892_s1 + $0x68] sm:$0xf0]  ;;  %v533_v10 = vor.u32 %v625_v6, %v532_v5  ;;  %v524_v12 = vld [vmem:[%s892_s1 + $0x50] sm:$0xf] }
   0x4   :  { %138 = vmatpush.bf16.msra.mxu0 %v541_v3  ;;  %v537_v11 = vor.u32 %v624_v8, %v534_v9  ;;  %v623_v13 = vld [vmem:[%s892_s1 + $0x54] sm:$0xf0]  ;;  %v622_v14 = vld [vmem:[%s892_s1 + $0x54] sm:$0xf]  ;;  %v526_v15 = vld [vmem:[%s892_s1 + $0x58] sm:$0xf0] }
   0x5   :  { %157 = vmatpush.bf16.msra.mxu1 %v545_v7  ;;  %v525_v16 = vor.u32 %v623_v13, %v524_v12  ;;  %v529_v17 = vor.u32 %v622_v14, %v526_v15  ;;  %v516_v18 = vld [vmem:[%s892_s1 + $0x40] sm:$0xf]  ;;  %v621_v19 = vld [vmem:[%s892_s1 + $0x44] sm:$0xf0]  ;;  %v620_v20 = vld [vmem:[%s892_s1 + $0x44] sm:$0xf] }
   0x6   :  { %v518_v21 = vld [vmem:[%s892_s1 + $0x48] sm:$0xf0]  ;;  %v517_v22 = vor.u32 %v621_v19, %v516_v18  ;;  %v508_v24 = vld [vmem:[%s892_s1 + $0x30] sm:$0xf]  ;;  %v619_v25 = vld [vmem:[%s892_s1 + $0x34] sm:$0xf0] }
   0x7   :  { %v521_v23 = vor.u32 %v620_v20, %v518_v21  ;;  %v618_v26 = vld [vmem:[%s892_s1 + $0x34] sm:$0xf]  ;;  %v510_v27 = vld [vmem:[%s892_s1 + $0x38] sm:$0xf0]  ;;  %v509_v28 = vor.u32 %v619_v25, %v508_v24  ;;  %v500_v30 = vld [vmem:[%s892_s1 + $0x20] sm:$0xf] }
   0x8   :  { %139 = vmatpush.bf16.msra.mxu0 %v533_v10  ;;  %v513_v29 = vor.u32 %v618_v26, %v510_v27  ;;  %v617_v31 = vld [vmem:[%s892_s1 + $0x24] sm:$0xf0]  ;;  %v616_v32 = vld [vmem:[%s892_s1 + $0x24] sm:$0xf]  ;;  %v502_v33 = vld [vmem:[%s892_s1 + $0x28] sm:$0xf0] }
   0x9   :  { %158 = vmatpush.bf16.msra.mxu1 %v537_v11  ;;  %v501_v34 = vor.u32 %v617_v31, %v500_v30  ;;  %v505_v35 = vor.u32 %v616_v32, %v502_v33  ;;  %v492_v36 = vld [vmem:[%s892_s1 + $0x10] sm:$0xf]  ;;  %v615_v37 = vld [vmem:[%s892_s1 + $0x14] sm:$0xf0]  ;;  %v614_v38 = vld [vmem:[%s892_s1 + $0x14] sm:$0xf] }
   0xa   :  { %v494_v39 = vld [vmem:[%s892_s1 + $0x18] sm:$0xf0]  ;;  %v493_v40 = vor.u32 %v615_v37, %v492_v36  ;;  %v484_v42 = vld [vmem:[%s892_s1] sm:$0xf]  ;;  %v613_v43 = vld [vmem:[%s892_s1 + $0x4] sm:$0xf0] }
   0xb   :  { %v497_v41 = vor.u32 %v614_v38, %v494_v39  ;;  %v612_v44 = vld [vmem:[%s892_s1 + $0x4] sm:$0xf]  ;;  %v486_v45 = vld [vmem:[%s892_s1 + $0x8] sm:$0xf0]  ;;  %v485_v46 = vor.u32 %v613_v43, %v484_v42  ;;  %v40_v50 = vld [vmem:[%s894_s2] sm:$0x3] }
   0xc   :  { %140 = vmatpush.bf16.msra.mxu0 %v525_v16  ;;  %v489_v47 = vor.u32 %v612_v44, %v486_v45  ;;  %v610_v48 = vld [vmem:[%s893_s0] sm:$0xff]  ;;  %v611_v49 = vld [vmem:[%s893_s0 + $0x8] sm:$0xff]  ;;  %v42_v51 = vperm.slane %v40_v50, 0  ;;  %v43_v52 = vperm.slane %v40_v50, 1  ;;  %v635_v53 = vld [vmem:[%s895_s3 + $0x38] sm:$0xff] }
   0xd   :  { %159 = vmatpush.bf16.msra.mxu1 %v529_v17  ;;  %v643_v54 = vld [vmem:[%s895_s3 + $0x78] sm:$0xff]  ;;  %356 = vmatpush.bf16.msra.mxu2 %v635_v53  ;;  %v634_v56 = vld [vmem:[%s895_s3 + $0x30] sm:$0xff]  ;;  %v633_v62 = vld [vmem:[%s895_s3 + $0x28] sm:$0xff] }
   0xe   :  { %375 = vmatpush.bf16.msra.mxu3 %v643_v54  ;;  %v642_v57 = vld [vmem:[%s895_s3 + $0x70] sm:$0xff]  ;;  %v641_v63 = vld [vmem:[%s895_s3 + $0x68] sm:$0xff]  ;;  %v632_v15 = vld [vmem:[%s895_s3 + $0x20] sm:$0xff] }
   0xf   :  { %v640_v16 = vld [vmem:[%s895_s3 + $0x60] sm:$0xff]  ;;  %v631_v17 = vld [vmem:[%s895_s3 + $0x18] sm:$0xff]  ;;  %v630_v19 = vld [vmem:[%s895_s3 + $0x10] sm:$0xff] }
  0x10   :  { %141 = vmatpush.bf16.msra.mxu0 %v517_v22  ;;  %v639_v18 = vld [vmem:[%s895_s3 + $0x58] sm:$0xff]  ;;  %v638_v20 = vld [vmem:[%s895_s3 + $0x50] sm:$0xff]  ;;  %v629_v21 = vld [vmem:[%s895_s3 + $0x8] sm:$0xff] }
  0x11   :  { %160 = vmatpush.bf16.msra.mxu1 %v521_v23  ;;  %357 = vmatpush.bf16.msra.mxu2 %v634_v56  ;;  %v637_v22 = vld [vmem:[%s895_s3 + $0x48] sm:$0xff]  ;;  %v628_v23 = vld [vmem:[%s895_s3] sm:$0xff] }
  0x12   :  { %376 = vmatpush.bf16.msra.mxu3 %v642_v57  ;;  %v636_v24 = vld [vmem:[%s895_s3 + $0x40] sm:$0xff] }
  0x14   :  { %142 = vmatpush.bf16.msra.mxu0 %v509_v28 }
  0x15   :  { %161 = vmatpush.bf16.msra.mxu1 %v513_v29  ;;  %358 = vmatpush.bf16.msra.mxu2 %v633_v62 }
  0x16   :  { %377 = vmatpush.bf16.msra.mxu3 %v641_v63 }
  0x18   :  { %143 = vmatpush.bf16.msra.mxu0 %v501_v34 }
  0x19   :  { %162 = vmatpush.bf16.msra.mxu1 %v505_v35  ;;  %359 = vmatpush.bf16.msra.mxu2 %v632_v15 }
  0x1a   :  { %378 = vmatpush.bf16.msra.mxu3 %v640_v16 }
  0x1c   :  { %144 = vmatpush.bf16.msra.mxu0 %v493_v40 }
  0x1d   :  { %163 = vmatpush.bf16.msra.mxu1 %v497_v41  ;;  %360 = vmatpush.bf16.msra.mxu2 %v631_v17 }
  0x1e   :  { %379 = vmatpush.bf16.msra.mxu3 %v639_v18 }
  0x20   :  { %145 = vmatpush.bf16.msra.mxu0 %v485_v46 }
  0x21   :  { %164 = vmatpush.bf16.msra.mxu1 %v489_v47  ;;  %361 = vmatpush.bf16.msra.mxu2 %v630_v19 }
  0x22   :  { %380 = vmatpush.bf16.msra.mxu3 %v638_v20 }
  0x23   :  { %146 = vmatmul.bf16.vlgmr.msra.gmra.mxu0 %v610_v48 }
  0x24   :  { %165 = vmatmul.bf16.vlgmr.msra.gmra.mxu1 %v610_v48 }
  0x25   :  { %362 = vmatpush.bf16.msra.mxu2 %v629_v21 }
  0x26   :  { %381 = vmatpush.bf16.msra.mxu3 %v637_v22 }
  0x29   :  { %363 = vmatpush.bf16.msra.mxu2 %v628_v23 }
  0x2a   :  { %382 = vmatpush.bf16.msra.mxu3 %v636_v24 }
  0x33   :  { %151 = vmatmul.bf16.gmra.mxu0 %v611_v49 }
  0x34   :  { %170 = vmatmul.bf16.gmra.mxu1 %v611_v49 }
  0xa0   :  { %v147_v55 = vpop.f32.mrf.mxu0 }
  0xa1   :  { %v148_v58 = vadd.f32 %v147_v55, %v42_v51  ;;  %v166_v59 = vpop.f32.mrf.mxu1 }
  0xa2   :  { %v167_v60 = vadd.f32 %v166_v59, %v43_v52 }
  0xa4   :  { %v176_v61 = vmax.f32 %v148_v58, %v167_v60 }
  0xa6   :  { %177 = vmax.xlane.f32.xlu0 %v176_v61 }
  0xa8   :  { %v149_v0 = vpop.f32.mrf.mxu0 }
  0xa9   :  { %v150_v1 = vadd.f32 %v149_v0, %v42_v51  ;;  %v168_v2 = vpop.f32.mrf.mxu1 }
  0xaa   :  { %v169_v3 = vadd.f32 %v168_v2, %v43_v52 }
  0xac   :  { %v179_v4 = vmax.f32 %v150_v1, %v169_v3 }
  0xae   :  { %180 = vmax.xlane.f32.xlu0 %v179_v4 }
  0xb0   :  { %v152_v5 = vpop.f32.mrf.mxu0 }
  0xb1   :  { %v153_v6 = vadd.f32 %v152_v5, %v42_v51  ;;  %v171_v7 = vpop.f32.mrf.mxu1 }
  0xb2   :  { %v172_v8 = vadd.f32 %v171_v7, %v43_v52 }
  0xb4   :  { %v182_v9 = vmax.f32 %v153_v6, %v172_v8 }
  0xb6   :  { %183 = vmax.xlane.f32.xlu1 %v182_v9 }
  0xb8   :  { %v154_v10 = vpop.f32.mrf.mxu0 }
  0xb9   :  { %v155_v11 = vadd.f32 %v154_v10, %v42_v51  ;;  %v173_v12 = vpop.f32.mrf.mxu1 }
  0xba   :  { %v174_v13 = vadd.f32 %v173_v12, %v43_v52 }
  0xbc   :  { %v185_v14 = vmax.f32 %v155_v11, %v174_v13 }
  0xbe   :  { %186 = vmax.xlane.f32.xlu1 %v185_v14 }
 0x119   :  { %v178_v25 = vpop.xlane.xlu0 %177 }
 0x11a   :  { %v188_v26 = vsub.f32 %v148_v58, %v178_v25  ;;  %v189_v27 = vsub.f32 %v167_v60, %v178_v25 }
 0x11c   :  { %v196_v28 = vmul.f32 1.442695, %v188_v26  ;;  %v198_v29 = vmul.f32 1.442695, %v189_v27 }
 0x11e   :  { %656 = vpow2.f32 %v196_v28 }
 0x11f   :  { %658 = vpow2.f32 %v198_v29 }
 0x121   :  { %v181_v30 = vpop.xlane.xlu0 %180 }
 0x122   :  { %v190_v31 = vsub.f32 %v150_v1, %v181_v30  ;;  %v191_v32 = vsub.f32 %v169_v3, %v181_v30 }
 0x124   :  { %v657_v33 = vpop.eup %656  ;;  %v200_v34 = vmul.f32 1.442695, %v190_v31  ;;  %v202_v35 = vmul.f32 1.442695, %v191_v32  ;;  %v655_v32 = vld [vmem:[%s896_s4] ss:$0 sm:$0xff] }
 0x125   :  { %v659_v36 = vpop.eup %658 }
 0x126   :  { %660 = vpow2.f32 %v200_v34  ;;  %v212_v37 = vadd.f32 %v659_v36, %v657_v33 }
 0x127   :  { %662 = vpow2.f32 %v202_v35 }
 0x128   :  { %213 = vadd.xlane.f32.xlu2 %v212_v37 }
 0x129   :  { %v184_v38 = vpop.xlane.xlu1 %183 }
 0x12a   :  { %v192_v39 = vsub.f32 %v153_v6, %v184_v38  ;;  %v193_v40 = vsub.f32 %v172_v8, %v184_v38 }
 0x12c   :  { %v661_v41 = vpop.eup %660  ;;  %v204_v42 = vmul.f32 1.442695, %v192_v39  ;;  %v206_v43 = vmul.f32 1.442695, %v193_v40 }
 0x12d   :  { %v663_v44 = vpop.eup %662  ;;  %v224_v45 = vpack.c.bf16 %v661_v41, %v657_v33 }
 0x12e   :  { %664 = vpow2.f32 %v204_v42  ;;  %v225_v46 = vpack.c.bf16 %v663_v44, %v659_v36  ;;  %v215_v47 = vadd.f32 %v663_v44, %v661_v41 }
 0x12f   :  { %666 = vpow2.f32 %v206_v43  ;;  %364 = vmatmul.bf16.vlgmr.msra.gmra.mxu2 %v224_v45 }
 0x130   :  { %383 = vmatmul.bf16.vlgmr.msra.gmra.mxu3 %v225_v46  ;;  %216 = vadd.xlane.f32.xlu2 %v215_v47 }
 0x131   :  { %v187_v48 = vpop.xlane.xlu1 %186 }
 0x132   :  { %v194_v49 = vsub.f32 %v155_v11, %v187_v48  ;;  %v195_v50 = vsub.f32 %v174_v13, %v187_v48 }
 0x134   :  { %v665_v51 = vpop.eup %664  ;;  %v208_v52 = vmul.f32 1.442695, %v194_v49  ;;  %v210_v53 = vmul.f32 1.442695, %v195_v50 }
 0x135   :  { %v667_v54 = vpop.eup %666 }
 0x136   :  { %668 = vpow2.f32 %v208_v52  ;;  %v218_v55 = vadd.f32 %v667_v54, %v665_v51 }
 0x137   :  { %670 = vpow2.f32 %v210_v53 }
 0x138   :  { %219 = vadd.xlane.f32.xlu0 %v218_v55 }
 0x13c   :  { %v669_v56 = vpop.eup %668 }
 0x13d   :  { %v671_v57 = vpop.eup %670  ;;  %v226_v58 = vpack.c.bf16 %v669_v56, %v665_v51 }
 0x13e   :  { %v221_v59 = vadd.f32 %v671_v57, %v669_v56  ;;  %v227_v60 = vpack.c.bf16 %v671_v57, %v667_v54 }
 0x13f   :  { %369 = vmatmul.bf16.gmra.mxu2 %v226_v58 }
 0x140   :  { %222 = vadd.xlane.f32.xlu1 %v221_v59  ;;  %388 = vmatmul.bf16.gmra.mxu3 %v227_v60 }
 0x19b   :  { %v214_v61 = vpop.xlane.xlu2 %213 }
 0x19c   :  { %672 = vrcp.f32 %v214_v61  ;;  %v405_v13 = vand.u32 2147483648, %v214_v61  ;;  %vm399_vm1 = vweird.f32 %v214_v61  ;;  %v403_v14 = vand.u32 2147483647, %v214_v61 }
 0x19e   :  { %v406_v22 = vor.u32 1.1754944e-38, %v405_v13  ;;  %vm404_vm6 = vcmp.eq.f32.partialorder %v403_v14, 8.507059e+37 }
 0x1a2   :  { %v673_v63 = vpop.eup %672 }
 0x1a3   :  { %v217_v62 = vpop.xlane.xlu2 %216  ;;  %v395_v0 = vmul.f32 %v673_v63, %v214_v61  ;;  %vm400_vm0 = vweird.f32 %v673_v63 }
 0x1a4   :  { %674 = vrcp.f32 %v217_v62  ;;  %vm413_vm3 = vweird.f32 %v217_v62  ;;  %v419_v16 = vand.u32 2147483648, %v217_v62  ;;  %vm401_vm4 = vmor %vm399_vm1, %vm400_vm0  ;;  %v417_v17 = vand.u32 2147483647, %v217_v62 }
 0x1a5   :  { %v396_v3 = vsub.f32 1.0, %v395_v0 }
 0x1a6   :  { %v420_v26 = vor.u32 1.1754944e-38, %v419_v16  ;;  %vm418_vm7 = vcmp.eq.f32.partialorder %v417_v17, 8.507059e+37 }
 0x1a7   :  { %v397_v6 = vmul.f32 %v673_v63, %v396_v3 }
 0x1a9   :  { %v398_v11 = vadd.f32 %v673_v63, %v397_v6 }
 0x1aa   :  { %v675_v1 = vpop.eup %674 }
 0x1ab   :  { %v409_v2 = vmul.f32 %v675_v1, %v217_v62  ;;  %v863_v4 = vpop.xlane.xlu0 %219  ;;  %vm414_vm2 = vweird.f32 %v675_v1  ;;  %v402_v20 = vsel %vm401_vm4, %v673_v63, %v398_v11 }
 0x1ac   :  { %676 = vrcp.f32 %v863_v4  ;;  %vm870_vm5 = vmor %vm413_vm3, %vm414_vm2  ;;  %v407_v28 = vsel %vm404_vm6, %v406_v22, %v402_v20  ;;  %v433_v45 = vand.u32 2147483648, %v863_v4  ;;  %vm427_vm9 = vweird.f32 %v863_v4 }
 0x1ad   :  { %v410_v5 = vsub.f32 1.0, %v409_v2  ;;  %v431_v46 = vand.u32 2147483647, %v863_v4 }
 0x1ae   :  { %v434_v52 = vor.u32 1.1754944e-38, %v433_v45 }
 0x1af   :  { %v411_v7 = vmul.f32 %v675_v1, %v410_v5  ;;  %vm432_vm14 = vcmp.eq.f32.partialorder %v431_v46, 8.507059e+37 }
 0x1b1   :  { %v412_v15 = vadd.f32 %v675_v1, %v411_v7 }
 0x1b2   :  { %v365_v8 = vpop.f32.mrf.mxu2  ;;  %v677_v12 = vpop.eup %676 }
 0x1b3   :  { %v866_v9 = vpop.xlane.xlu1 %222  ;;  %v384_v10 = vpop.f32.mrf.mxu3  ;;  %v423_v18 = vmul.f32 %v677_v12, %v863_v4  ;;  %v416_v25 = vsel %vm870_vm5, %v675_v1, %v412_v15  ;;  %vm428_vm8 = vweird.f32 %v677_v12 }
 0x1b4   :  { %678 = vrcp.f32 %v866_v9  ;;  %v385_v19 = vadd.f32 %v384_v10, %v365_v8  ;;  %v421_v34 = vsel %vm418_vm7, %v420_v26, %v416_v25  ;;  %vm429_vm11 = vmor %vm427_vm9, %vm428_vm8  ;;  %v447_v48 = vand.u32 2147483648, %v866_v9 }
 0x1b5   :  { %v424_v30 = vsub.f32 1.0, %v423_v18  ;;  %vm441_vm12 = vweird.f32 %v866_v9  ;;  %v445_v49 = vand.u32 2147483647, %v866_v9 }
 0x1b6   :  { %v450_v31 = vmul.f32 %v407_v28, %v385_v19  ;;  %v448_v55 = vor.u32 1.1754944e-38, %v447_v48 }
 0x1b7   :  { %v425_v37 = vmul.f32 %v677_v12, %v424_v30  ;;  %vm446_vm15 = vcmp.eq.f32.partialorder %v445_v49, 8.507059e+37 }
 0x1b8   :  { %v458_v38 = vadd.f32 %v655_v32, %v450_v31 }
 0x1b9   :  { %v426_v44 = vadd.f32 %v677_v12, %v425_v37 }
 0x1ba   :  { %v679_v23 = vpop.eup %678  ;;  %v367_v24 = vpop.f32.mrf.mxu2 }
 0x1bb   :  { %v437_v27 = vmul.f32 %v679_v23, %v866_v9  ;;  %v386_v29 = vpop.f32.mrf.mxu3  ;;  %vm442_vm10 = vweird.f32 %v679_v23  ;;  %v430_v51 = vsel %vm429_vm11, %v677_v12, %v426_v44 }
 0x1bc   :  { %v387_v33 = vadd.f32 %v386_v29, %v367_v24  ;;  %vm443_vm13 = vmor %vm441_vm12, %vm442_vm10  ;;  %v435_v56 = vsel %vm432_vm14, %v434_v52, %v430_v51 }
 0x1bd   :  { %v438_v35 = vsub.f32 1.0, %v437_v27 }
 0x1be   :  { %v451_v36 = vmul.f32 %v421_v34, %v387_v33 }
 0x1bf   :  { %v439_v40 = vmul.f32 %v679_v23, %v438_v35 }
 0x1c0   :  { %v459_v39 = vadd.f32 %v655_v32, %v451_v36 }
 0x1c1   :  { %v440_v47 = vadd.f32 %v679_v23, %v439_v40 }
 0x1c2   :  { %v647_v41 = vpack.c.bf16 %v459_v39, %v458_v38  ;;  %v370_v42 = vpop.f32.mrf.mxu2 }
 0x1c3   :  { %v389_v43 = vpop.f32.mrf.mxu3  ;;  %v444_v54 = vsel %vm443_vm13, %v679_v23, %v440_v47 }
 0x1c4   :  { %648 = vst [vmem:[%s897_s5] sm:$0xff] %v647_v41   ;;  %v390_v50 = vadd.f32 %v389_v43, %v370_v42  ;;  %v449_v60 = vsel %vm446_vm15, %v448_v55, %v444_v54 }
 0x1c6   :  { %v452_v58 = vmul.f32 %v435_v56, %v390_v50 }
 0x1c8   :  { %v460_v62 = vadd.f32 %v655_v32, %v452_v58 }
 0x1ca   :  { %v372_v53 = vpop.f32.mrf.mxu2 }
 0x1cb   :  { %v391_v57 = vpop.f32.mrf.mxu3 }
 0x1cc   :  { %v392_v59 = vadd.f32 %v391_v57, %v372_v53 }
 0x1ce   :  { %v453_v61 = vmul.f32 %v449_v60, %v392_v59 }
 0x1d0   :  { %v461_v63 = vadd.f32 %v655_v32, %v453_v61 }
 0x1d2   :  { %v652_v0 = vpack.c.bf16 %v461_v63, %v460_v62 }
 0x1d4   :  { %654 = vst [vmem:[%s897_s5 + $0x8] sm:$0xff] %v652_v0  }

// kernel: squeeze.3
= control target key start
LH: loop header
LB: loop body
LE: loop exit
PB: predicated region body
PF: predicated region fallthrough
CT: control target
= control target key end

     0   :  { %s3185_s10 = smov 112   ;;  %vm3_vm0 = vcmask 130048   ;;  %s3187_s25 = smov 80   ;;  %s6370_s0 = inlined_call_operand.vmem [shape: f32[256,1,128], index: 0, kind: input, shape index: {}]   ;;  %s6371_s1 = inlined_call_operand.vmem [shape: f32[1,16,16,8,4,4], index: 1, kind: output, shape index: {}]  }
   0x1   :  { %v3205_v0 = vld.sshfl [vmem:[%s6370_s0 + $0x10] sm:$0xff pattern:$0xb3a29180]   ;;  %v3210_v1 = vld.sshfl [vmem:[%s6370_s0] sm:$0xff pattern:$0xb3a29180]  }
   0x2   :  { %368 = vrot.lane.b32.xlu1 %v3205_v0, %s3185_s10  ;;  %350 = vrot.lane.b32.xlu0 %v3210_v1, %s3185_s10  ;;  %v3219_v2 = vld.sshfl [vmem:[%s6370_s0 + $0x20] sm:$0xff pattern:$0xb3a29180]   ;;  %v3226_v3 = vld.sshfl [vmem:[%s6370_s0 + $0x14] sm:$0xff pattern:$0xb3a29180]  }
   0x3   :  { %386 = vrot.lane.b32.xlu2 %v3219_v2, %s3185_s10  ;;  %v3231_v4 = vld.sshfl [vmem:[%s6370_s0 + $0x4] sm:$0xff pattern:$0xb3a29180]   ;;  %v3247_v6 = vld.sshfl [vmem:[%s6370_s0 + $0x34] sm:$0xff pattern:$0xb3a29180]  }
   0x4   :  { %v3240_v5 = vld.sshfl [vmem:[%s6370_s0 + $0x24] sm:$0xff pattern:$0xb3a29180]   ;;  %v3252_v7 = vld.sshfl [vmem:[%s6370_s0 + $0x30] sm:$0xff pattern:$0xb3a29180]  }
   0x5   :  { %v3261_v8 = vld.sshfl [vmem:[%s6370_s0 + $0x40] sm:$0xff pattern:$0xb3a29180]   ;;  %v3268_v9 = vld.sshfl [vmem:[%s6370_s0 + $0x50] sm:$0xff pattern:$0xb3a29180]  }
   0x6   :  { %v3273_v10 = vld.sshfl [vmem:[%s6370_s0 + $0x44] sm:$0xff pattern:$0xb3a29180]   ;;  %v3282_v11 = vld.sshfl [vmem:[%s6370_s0 + $0x54] sm:$0xff pattern:$0xb3a29180]  }
   0x7   :  { %v3289_v12 = vld.sshfl [vmem:[%s6370_s0 + $0x64] sm:$0xff pattern:$0xb3a29180]   ;;  %v3294_v13 = vld.sshfl [vmem:[%s6370_s0 + $0x60] sm:$0xff pattern:$0xb3a29180]  }
   0x8   :  { %v3303_v14 = vld.sshfl [vmem:[%s6370_s0 + $0x70] sm:$0xff pattern:$0xb3a29180]   ;;  %v3310_v15 = vld.sshfl [vmem:[%s6370_s0 + $0x80] sm:$0xff pattern:$0xb3a29180]  }
   0x9   :  { %v3315_v16 = vld.sshfl [vmem:[%s6370_s0 + $0x74] sm:$0xff pattern:$0xb3a29180]   ;;  %v3324_v17 = vld.sshfl [vmem:[%s6370_s0 + $0x84] sm:$0xff pattern:$0xb3a29180]  }
   0xa   :  { %377 = vrot.lane.b32.xlu1 %v3226_v3, %s3185_s10  ;;  %359 = vrot.lane.b32.xlu0 %v3231_v4, %s3185_s10  ;;  %v3331_v18 = vld.sshfl [vmem:[%s6370_s0 + $0x94] sm:$0xff pattern:$0xb3a29180]   ;;  %v3336_v19 = vld.sshfl [vmem:[%s6370_s0 + $0x90] sm:$0xff pattern:$0xb3a29180]  }
   0xb   :  { %395 = vrot.lane.b32.xlu2 %v3240_v5, %s3185_s10  ;;  %v3345_v20 = vld.sshfl [vmem:[%s6370_s0 + $0xa0] sm:$0xff pattern:$0xb3a29180]   ;;  %v3352_v21 = vld.sshfl [vmem:[%s6370_s0 + $0xb0] sm:$0xff pattern:$0xb3a29180]  }
   0xc   :  { %v3357_v22 = vld.sshfl [vmem:[%s6370_s0 + $0xa4] sm:$0xff pattern:$0xb3a29180]   ;;  %v3366_v23 = vld.sshfl [vmem:[%s6370_s0 + $0xb4] sm:$0xff pattern:$0xb3a29180]  }
   0xd   :  { %v3373_v24 = vld.sshfl [vmem:[%s6370_s0 + $0xc4] sm:$0xff pattern:$0xb3a29180]   ;;  %v3378_v25 = vld.sshfl [vmem:[%s6370_s0 + $0xc0] sm:$0xff pattern:$0xb3a29180]  }
   0xe   :  { %v3387_v26 = vld.sshfl [vmem:[%s6370_s0 + $0xd0] sm:$0xff pattern:$0xb3a29180]   ;;  %v3394_v27 = vld.sshfl [vmem:[%s6370_s0 + $0xe0] sm:$0xff pattern:$0xb3a29180]  }
   0xf   :  { %v3399_v28 = vld.sshfl [vmem:[%s6370_s0 + $0xd4] sm:$0xff pattern:$0xb3a29180]   ;;  %v3408_v29 = vld.sshfl [vmem:[%s6370_s0 + $0xe4] sm:$0xff pattern:$0xb3a29180]  }
  0x10   :  { %v3415_v30 = vld.sshfl [vmem:[%s6370_s0 + $0xf4] sm:$0xff pattern:$0xb3a29180]   ;;  %v3420_v31 = vld.sshfl [vmem:[%s6370_s0 + $0xf0] sm:$0xff pattern:$0xb3a29180]  }
  0x11   :  { %s3188_s16 = smov 64   ;;  %s3189_s3 = smov 48  }
  0x12   :  { %413 = vrot.lane.b32.xlu1 %v3247_v6, %s3185_s10  ;;  %404 = vrot.lane.b32.xlu0 %v3252_v7, %s3185_s10  ;;  %s3190_s21 = smov 32   ;;  %s3191_s15 = smov 16  }
  0x13   :  { %422 = vrot.lane.b32.xlu2 %v3261_v8, %s3185_s10 }
  0x1a   :  { %440 = vrot.lane.b32.xlu1 %v3268_v9, %s3185_s10  ;;  %431 = vrot.lane.b32.xlu0 %v3273_v10, %s3185_s10 }
  0x1b   :  { %449 = vrot.lane.b32.xlu2 %v3282_v11, %s3185_s10 }
  0x22   :  { %467 = vrot.lane.b32.xlu1 %v3289_v12, %s3185_s10  ;;  %458 = vrot.lane.b32.xlu0 %v3294_v13, %s3185_s10 }
  0x23   :  { %476 = vrot.lane.b32.xlu2 %v3303_v14, %s3185_s10 }
  0x2a   :  { %494 = vrot.lane.b32.xlu1 %v3310_v15, %s3185_s10  ;;  %485 = vrot.lane.b32.xlu0 %v3315_v16, %s3185_s10 }
  0x2b   :  { %503 = vrot.lane.b32.xlu2 %v3324_v17, %s3185_s10 }
  0x32   :  { %521 = vrot.lane.b32.xlu1 %v3331_v18, %s3185_s10  ;;  %512 = vrot.lane.b32.xlu0 %v3336_v19, %s3185_s10 }
  0x33   :  { %530 = vrot.lane.b32.xlu2 %v3345_v20, %s3185_s10 }
  0x3a   :  { %548 = vrot.lane.b32.xlu1 %v3352_v21, %s3185_s10  ;;  %539 = vrot.lane.b32.xlu0 %v3357_v22, %s3185_s10 }
  0x3b   :  { %557 = vrot.lane.b32.xlu2 %v3366_v23, %s3185_s10 }
  0x42   :  { %575 = vrot.lane.b32.xlu1 %v3373_v24, %s3185_s10  ;;  %566 = vrot.lane.b32.xlu0 %v3378_v25, %s3185_s10 }
  0x43   :  { %584 = vrot.lane.b32.xlu2 %v3387_v26, %s3185_s10 }
  0x4a   :  { %602 = vrot.lane.b32.xlu1 %v3394_v27, %s3185_s10  ;;  %593 = vrot.lane.b32.xlu0 %v3399_v28, %s3185_s10 }
  0x4b   :  { %611 = vrot.lane.b32.xlu2 %v3408_v29, %s3185_s10 }
  0x52   :  { %629 = vrot.lane.b32.xlu1 %v3415_v30, %s3185_s10  ;;  %620 = vrot.lane.b32.xlu0 %v3420_v31, %s3185_s10  ;;  %s3186_s10 = smov 96  }
  0x53   :  { %637 = vrot.lane.b32.xlu2 %v3210_v1, %s3186_s10 }
  0x5a   :  { %655 = vrot.lane.b32.xlu1 %v3205_v0, %s3186_s10  ;;  %646 = vrot.lane.b32.xlu0 %v3231_v4, %s3186_s10 }
  0x5b   :  { %664 = vrot.lane.b32.xlu2 %v3226_v3, %s3186_s10 }
  0x5d   :  { %v387_v32 = vpop.permute.xlu2 %386  }
  0x5e   :  { %2525 = vst.msk [vmem:[%s6371_s1 + $0x101] ss:$8 sm:$0xf] %vm3_vm0, %v387_v32  }
  0x5f   :  { %2526 = vst.msk [vmem:[%s6371_s1 + $0x101] ss:$8 sm:$0xf0] %vm3_vm0, %v387_v32  }
  0x62   :  { %682 = vrot.lane.b32.xlu1 %v3240_v5, %s3186_s10  ;;  %673 = vrot.lane.b32.xlu0 %v3219_v2, %s3186_s10 }
  0x63   :  { %691 = vrot.lane.b32.xlu2 %v3252_v7, %s3186_s10 }
  0x65   :  { %v396_v33 = vpop.permute.xlu2 %395  }
  0x66   :  { %2528 = vst.msk [vmem:[%s6371_s1 + $0x141] ss:$8 sm:$0xf] %vm3_vm0, %v396_v33  }
  0x67   :  { %2529 = vst.msk [vmem:[%s6371_s1 + $0x141] ss:$8 sm:$0xf0] %vm3_vm0, %v396_v33  }
  0x6a   :  { %709 = vrot.lane.b32.xlu1 %v3261_v8, %s3186_s10  ;;  %700 = vrot.lane.b32.xlu0 %v3247_v6, %s3186_s10 }
  0x6b   :  { %718 = vrot.lane.b32.xlu2 %v3273_v10, %s3186_s10 }
  0x6d   :  { %v423_v34 = vpop.permute.xlu2 %422  }
  0x6e   :  { %2537 = vst.msk [vmem:[%s6371_s1 + $0x201] ss:$8 sm:$0xf] %vm3_vm0, %v423_v34  }
  0x6f   :  { %2538 = vst.msk [vmem:[%s6371_s1 + $0x201] ss:$8 sm:$0xf0] %vm3_vm0, %v423_v34  }
  0x72   :  { %736 = vrot.lane.b32.xlu1 %v3282_v11, %s3186_s10  ;;  %727 = vrot.lane.b32.xlu0 %v3268_v9, %s3186_s10 }
  0x73   :  { %745 = vrot.lane.b32.xlu2 %v3294_v13, %s3186_s10 }
  0x74   :  { %v369_v35 = vpop.permute.xlu1 %368   ;;  %v351_v36 = vpop.permute.xlu0 %350  }
  0x75   :  { %2519 = vst.msk [vmem:[%s6371_s1 + $0x81] ss:$8 sm:$0xf] %vm3_vm0, %v369_v35   ;;  %v450_v37 = vpop.permute.xlu2 %449  }
  0x76   :  { %2520 = vst.msk [vmem:[%s6371_s1 + $0x81] ss:$8 sm:$0xf0] %vm3_vm0, %v369_v35  }
  0x77   :  { %2513 = vst.msk [vmem:[%s6371_s1 + $0x1] ss:$8 sm:$0xf] %vm3_vm0, %v351_v36  }
  0x78   :  { %2514 = vst.msk [vmem:[%s6371_s1 + $0x1] ss:$8 sm:$0xf0] %vm3_vm0, %v351_v36  }
  0x79   :  { %2546 = vst.msk [vmem:[%s6371_s1 + $0x2c1] ss:$8 sm:$0xf] %vm3_vm0, %v450_v37  }
  0x7a   :  { %763 = vrot.lane.b32.xlu1 %v3303_v14, %s3186_s10  ;;  %754 = vrot.lane.b32.xlu0 %v3289_v12, %s3186_s10  ;;  %2547 = vst.msk [vmem:[%s6371_s1 + $0x2c1] ss:$8 sm:$0xf0] %vm3_vm0, %v450_v37  }
  0x7b   :  { %772 = vrot.lane.b32.xlu2 %v3315_v16, %s3186_s10 }
  0x7c   :  { %v378_v38 = vpop.permute.xlu1 %377   ;;  %v360_v39 = vpop.permute.xlu0 %359  }
  0x7d   :  { %2522 = vst.msk [vmem:[%s6371_s1 + $0xc1] ss:$8 sm:$0xf] %vm3_vm0, %v378_v38   ;;  %v477_v40 = vpop.permute.xlu2 %476  }
  0x7e   :  { %2523 = vst.msk [vmem:[%s6371_s1 + $0xc1] ss:$8 sm:$0xf0] %vm3_vm0, %v378_v38  }
  0x7f   :  { %2516 = vst.msk [vmem:[%s6371_s1 + $0x41] ss:$8 sm:$0xf] %vm3_vm0, %v360_v39  }
  0x80   :  { %2517 = vst.msk [vmem:[%s6371_s1 + $0x41] ss:$8 sm:$0xf0] %vm3_vm0, %v360_v39  }
  0x81   :  { %2555 = vst.msk [vmem:[%s6371_s1 + $0x381] ss:$8 sm:$0xf] %vm3_vm0, %v477_v40  }
  0x82   :  { %790 = vrot.lane.b32.xlu1 %v3324_v17, %s3186_s10  ;;  %781 = vrot.lane.b32.xlu0 %v3310_v15, %s3186_s10  ;;  %2556 = vst.msk [vmem:[%s6371_s1 + $0x381] ss:$8 sm:$0xf0] %vm3_vm0, %v477_v40  }
  0x83   :  { %799 = vrot.lane.b32.xlu2 %v3336_v19, %s3186_s10 }
  0x84   :  { %v414_v41 = vpop.permute.xlu1 %413   ;;  %v405_v42 = vpop.permute.xlu0 %404  }
  0x85   :  { %2534 = vst.msk [vmem:[%s6371_s1 + $0x1c1] ss:$8 sm:$0xf] %vm3_vm0, %v414_v41   ;;  %v504_v43 = vpop.permute.xlu2 %503  }
  0x86   :  { %2535 = vst.msk [vmem:[%s6371_s1 + $0x1c1] ss:$8 sm:$0xf0] %vm3_vm0, %v414_v41  }
  0x87   :  { %2531 = vst.msk [vmem:[%s6371_s1 + $0x181] ss:$8 sm:$0xf] %vm3_vm0, %v405_v42  }
  0x88   :  { %2532 = vst.msk [vmem:[%s6371_s1 + $0x181] ss:$8 sm:$0xf0] %vm3_vm0, %v405_v42  }
  0x89   :  { %2564 = vst.msk [vmem:[%s6371_s1 + $0x441] ss:$8 sm:$0xf] %vm3_vm0, %v504_v43  }
  0x8a   :  { %817 = vrot.lane.b32.xlu1 %v3345_v20, %s3186_s10  ;;  %808 = vrot.lane.b32.xlu0 %v3331_v18, %s3186_s10  ;;  %2565 = vst.msk [vmem:[%s6371_s1 + $0x441] ss:$8 sm:$0xf0] %vm3_vm0, %v504_v43  }
  0x8b   :  { %826 = vrot.lane.b32.xlu2 %v3357_v22, %s3186_s10 }
  0x8c   :  { %v441_v44 = vpop.permute.xlu1 %440   ;;  %v432_v45 = vpop.permute.xlu0 %431  }
  0x8d   :  { %2543 = vst.msk [vmem:[%s6371_s1 + $0x281] ss:$8 sm:$0xf] %vm3_vm0, %v441_v44   ;;  %v531_v46 = vpop.permute.xlu2 %530  }
  0x8e   :  { %2544 = vst.msk [vmem:[%s6371_s1 + $0x281] ss:$8 sm:$0xf0] %vm3_vm0, %v441_v44  }
  0x8f   :  { %2540 = vst.msk [vmem:[%s6371_s1 + $0x241] ss:$8 sm:$0xf] %vm3_vm0, %v432_v45  }
  0x90   :  { %2541 = vst.msk [vmem:[%s6371_s1 + $0x241] ss:$8 sm:$0xf0] %vm3_vm0, %v432_v45  }
  0x91   :  { %2573 = vst.msk [vmem:[%s6371_s1 + $0x501] ss:$8 sm:$0xf] %vm3_vm0, %v531_v46  }
  0x92   :  { %844 = vrot.lane.b32.xlu1 %v3366_v23, %s3186_s10  ;;  %835 = vrot.lane.b32.xlu0 %v3352_v21, %s3186_s10  ;;  %2574 = vst.msk [vmem:[%s6371_s1 + $0x501] ss:$8 sm:$0xf0] %vm3_vm0, %v531_v46  }
  0x93   :  { %853 = vrot.lane.b32.xlu2 %v3378_v25, %s3186_s10 }
  0x94   :  { %v468_v47 = vpop.permute.xlu1 %467   ;;  %v459_v48 = vpop.permute.xlu0 %458  }
  0x95   :  { %2552 = vst.msk [vmem:[%s6371_s1 + $0x341] ss:$8 sm:$0xf] %vm3_vm0, %v468_v47   ;;  %v558_v49 = vpop.permute.xlu2 %557  }
  0x96   :  { %2553 = vst.msk [vmem:[%s6371_s1 + $0x341] ss:$8 sm:$0xf0] %vm3_vm0, %v468_v47  }
  0x97   :  { %2549 = vst.msk [vmem:[%s6371_s1 + $0x301] ss:$8 sm:$0xf] %vm3_vm0, %v459_v48  }
  0x98   :  { %2550 = vst.msk [vmem:[%s6371_s1 + $0x301] ss:$8 sm:$0xf0] %vm3_vm0, %v459_v48  }
  0x99   :  { %2582 = vst.msk [vmem:[%s6371_s1 + $0x5c1] ss:$8 sm:$0xf] %vm3_vm0, %v558_v49  }
  0x9a   :  { %871 = vrot.lane.b32.xlu1 %v3387_v26, %s3186_s10  ;;  %862 = vrot.lane.b32.xlu0 %v3373_v24, %s3186_s10  ;;  %2583 = vst.msk [vmem:[%s6371_s1 + $0x5c1] ss:$8 sm:$0xf0] %vm3_vm0, %v558_v49  }
  0x9b   :  { %880 = vrot.lane.b32.xlu2 %v3399_v28, %s3186_s10 }
  0x9c   :  { %v495_v50 = vpop.permute.xlu1 %494   ;;  %v486_v51 = vpop.permute.xlu0 %485  }
  0x9d   :  { %2561 = vst.msk [vmem:[%s6371_s1 + $0x401] ss:$8 sm:$0xf] %vm3_vm0, %v495_v50   ;;  %v585_v52 = vpop.permute.xlu2 %584  }
  0x9e   :  { %2562 = vst.msk [vmem:[%s6371_s1 + $0x401] ss:$8 sm:$0xf0] %vm3_vm0, %v495_v50  }
  0x9f   :  { %2558 = vst.msk [vmem:[%s6371_s1 + $0x3c1] ss:$8 sm:$0xf] %vm3_vm0, %v486_v51  }
  0xa0   :  { %2559 = vst.msk [vmem:[%s6371_s1 + $0x3c1] ss:$8 sm:$0xf0] %vm3_vm0, %v486_v51  }
  0xa1   :  { %2591 = vst.msk [vmem:[%s6371_s1 + $0x681] ss:$8 sm:$0xf] %vm3_vm0, %v585_v52  }
  0xa2   :  { %898 = vrot.lane.b32.xlu1 %v3408_v29, %s3186_s10  ;;  %889 = vrot.lane.b32.xlu0 %v3394_v27, %s3186_s10  ;;  %2592 = vst.msk [vmem:[%s6371_s1 + $0x681] ss:$8 sm:$0xf0] %vm3_vm0, %v585_v52  }
  0xa3   :  { %907 = vrot.lane.b32.xlu2 %v3420_v31, %s3186_s10 }
  0xa4   :  { %v522_v53 = vpop.permute.xlu1 %521   ;;  %v513_v54 = vpop.permute.xlu0 %512  }
  0xa5   :  { %2570 = vst.msk [vmem:[%s6371_s1 + $0x4c1] ss:$8 sm:$0xf] %vm3_vm0, %v522_v53   ;;  %v612_v55 = vpop.permute.xlu2 %611  }
  0xa6   :  { %2571 = vst.msk [vmem:[%s6371_s1 + $0x4c1] ss:$8 sm:$0xf0] %vm3_vm0, %v522_v53  }
  0xa7   :  { %2567 = vst.msk [vmem:[%s6371_s1 + $0x481] ss:$8 sm:$0xf] %vm3_vm0, %v513_v54  }
  0xa8   :  { %2568 = vst.msk [vmem:[%s6371_s1 + $0x481] ss:$8 sm:$0xf0] %vm3_vm0, %v513_v54  }
  0xa9   :  { %2600 = vst.msk [vmem:[%s6371_s1 + $0x741] ss:$8 sm:$0xf] %vm3_vm0, %v612_v55  }
  0xaa   :  { %924 = vrot.lane.b32.xlu1 %v3210_v1, %s3187_s25  ;;  %916 = vrot.lane.b32.xlu0 %v3415_v30, %s3186_s10  ;;  %2601 = vst.msk [vmem:[%s6371_s1 + $0x741] ss:$8 sm:$0xf0] %vm3_vm0, %v612_v55  }
  0xab   :  { %933 = vrot.lane.b32.xlu2 %v3231_v4, %s3187_s25 }
  0xac   :  { %v549_v56 = vpop.permute.xlu1 %548   ;;  %v540_v57 = vpop.permute.xlu0 %539  }
  0xad   :  { %2579 = vst.msk [vmem:[%s6371_s1 + $0x581] ss:$8 sm:$0xf] %vm3_vm0, %v549_v56   ;;  %v638_v58 = vpop.permute.xlu2 %637  }
  0xae   :  { %2580 = vst.msk [vmem:[%s6371_s1 + $0x581] ss:$8 sm:$0xf0] %vm3_vm0, %v549_v56  }
  0xaf   :  { %2576 = vst.msk [vmem:[%s6371_s1 + $0x541] ss:$8 sm:$0xf] %vm3_vm0, %v540_v57  }
  0xb0   :  { %2577 = vst.msk [vmem:[%s6371_s1 + $0x541] ss:$8 sm:$0xf0] %vm3_vm0, %v540_v57  }
  0xb1   :  { %2608 = vst.msk [vmem:[%s6371_s1 + $0x2] ss:$8 sm:$0xf] %vm3_vm0, %v638_v58  }
  0xb2   :  { %951 = vrot.lane.b32.xlu1 %v3226_v3, %s3187_s25  ;;  %942 = vrot.lane.b32.xlu0 %v3205_v0, %s3187_s25  ;;  %2609 = vst.msk [vmem:[%s6371_s1 + $0x2] ss:$8 sm:$0xf0] %vm3_vm0, %v638_v58  }
  0xb3   :  { %960 = vrot.lane.b32.xlu2 %v3219_v2, %s3187_s25 }
  0xb4   :  { %v576_v59 = vpop.permute.xlu1 %575   ;;  %v567_v60 = vpop.permute.xlu0 %566  }
  0xb5   :  { %2588 = vst.msk [vmem:[%s6371_s1 + $0x641] ss:$8 sm:$0xf] %vm3_vm0, %v576_v59   ;;  %v665_v61 = vpop.permute.xlu2 %664  }
  0xb6   :  { %2589 = vst.msk [vmem:[%s6371_s1 + $0x641] ss:$8 sm:$0xf0] %vm3_vm0, %v576_v59  }
  0xb7   :  { %2585 = vst.msk [vmem:[%s6371_s1 + $0x601] ss:$8 sm:$0xf] %vm3_vm0, %v567_v60  }
  0xb8   :  { %2586 = vst.msk [vmem:[%s6371_s1 + $0x601] ss:$8 sm:$0xf0] %vm3_vm0, %v567_v60   ;;  %v4336_v60 = vld.sshfl [vmem:[%s6370_s0 + $0x10] sm:$0xff pattern:$0xb3a29180]  }
  0xb9   :  { %2617 = vst.msk [vmem:[%s6371_s1 + $0xc2] ss:$8 sm:$0xf] %vm3_vm0, %v665_v61  }
  0xba   :  { %978 = vrot.lane.b32.xlu1 %v3252_v7, %s3187_s25  ;;  %969 = vrot.lane.b32.xlu0 %v3240_v5, %s3187_s25  ;;  %2618 = vst.msk [vmem:[%s6371_s1 + $0xc2] ss:$8 sm:$0xf0] %vm3_vm0, %v665_v61  }
  0xbb   :  { %987 = vrot.lane.b32.xlu2 %v3247_v6, %s3187_s25 }
  0xbc   :  { %v603_v62 = vpop.permute.xlu1 %602   ;;  %v594_v63 = vpop.permute.xlu0 %593  }
  0xbd   :  { %2597 = vst.msk [vmem:[%s6371_s1 + $0x701] ss:$8 sm:$0xf] %vm3_vm0, %v603_v62   ;;  %v692_v32 = vpop.permute.xlu2 %691  }
  0xbe   :  { %2598 = vst.msk [vmem:[%s6371_s1 + $0x701] ss:$8 sm:$0xf0] %vm3_vm0, %v603_v62  }
  0xbf   :  { %2594 = vst.msk [vmem:[%s6371_s1 + $0x6c1] ss:$8 sm:$0xf] %vm3_vm0, %v594_v63  }
  0xc0   :  { %2595 = vst.msk [vmem:[%s6371_s1 + $0x6c1] ss:$8 sm:$0xf0] %vm3_vm0, %v594_v63  }
  0xc1   :  { %2626 = vst.msk [vmem:[%s6371_s1 + $0x182] ss:$8 sm:$0xf] %vm3_vm0, %v692_v32  }
  0xc2   :  { %1005 = vrot.lane.b32.xlu1 %v3273_v10, %s3187_s25  ;;  %996 = vrot.lane.b32.xlu0 %v3261_v8, %s3187_s25  ;;  %2627 = vst.msk [vmem:[%s6371_s1 + $0x182] ss:$8 sm:$0xf0] %vm3_vm0, %v692_v32   ;;  %v4376_v32 = vld.sshfl [vmem:[%s6370_s0 + $0x20] sm:$0xff pattern:$0xb3a29180]  }
  0xc3   :  { %1014 = vrot.lane.b32.xlu2 %v3268_v9, %s3187_s25 }
  0xc4   :  { %v630_v33 = vpop.permute.xlu1 %629   ;;  %v621_v34 = vpop.permute.xlu0 %620  }
  0xc5   :  { %2606 = vst.msk [vmem:[%s6371_s1 + $0x7c1] ss:$8 sm:$0xf] %vm3_vm0, %v630_v33   ;;  %v719_v35 = vpop.permute.xlu2 %718  }
  0xc6   :  { %2607 = vst.msk [vmem:[%s6371_s1 + $0x7c1] ss:$8 sm:$0xf0] %vm3_vm0, %v630_v33  }
  0xc7   :  { %2603 = vst.msk [vmem:[%s6371_s1 + $0x781] ss:$8 sm:$0xf] %vm3_vm0, %v621_v34  }
  0xc8   :  { %2604 = vst.msk [vmem:[%s6371_s1 + $0x781] ss:$8 sm:$0xf0] %vm3_vm0, %v621_v34  }
  0xc9   :  { %2635 = vst.msk [vmem:[%s6371_s1 + $0x242] ss:$8 sm:$0xf] %vm3_vm0, %v719_v35  }
  0xca   :  { %1032 = vrot.lane.b32.xlu1 %v3294_v13, %s3187_s25  ;;  %1023 = vrot.lane.b32.xlu0 %v3282_v11, %s3187_s25  ;;  %2636 = vst.msk [vmem:[%s6371_s1 + $0x242] ss:$8 sm:$0xf0] %vm3_vm0, %v719_v35  }
  0xcb   :  { %1041 = vrot.lane.b32.xlu2 %v3289_v12, %s3187_s25 }
  0xcc   :  { %v656_v36 = vpop.permute.xlu1 %655   ;;  %v647_v37 = vpop.permute.xlu0 %646  }
  0xcd   :  { %2614 = vst.msk [vmem:[%s6371_s1 + $0x82] ss:$8 sm:$0xf] %vm3_vm0, %v656_v36   ;;  %v746_v38 = vpop.permute.xlu2 %745  }
  0xce   :  { %2615 = vst.msk [vmem:[%s6371_s1 + $0x82] ss:$8 sm:$0xf0] %vm3_vm0, %v656_v36   ;;  %v4410_v36 = vld.sshfl [vmem:[%s6370_s0 + $0x40] sm:$0xff pattern:$0xb3a29180]  }
  0xcf   :  { %2611 = vst.msk [vmem:[%s6371_s1 + $0x42] ss:$8 sm:$0xf] %vm3_vm0, %v647_v37  }
  0xd0   :  { %2612 = vst.msk [vmem:[%s6371_s1 + $0x42] ss:$8 sm:$0xf0] %vm3_vm0, %v647_v37   ;;  %v4421_v37 = vld.sshfl [vmem:[%s6370_s0 + $0x34] sm:$0xff pattern:$0xb3a29180]  }
  0xd1   :  { %2644 = vst.msk [vmem:[%s6371_s1 + $0x302] ss:$8 sm:$0xf] %vm3_vm0, %v746_v38  }
  0xd2   :  { %1059 = vrot.lane.b32.xlu1 %v3315_v16, %s3187_s25  ;;  %1050 = vrot.lane.b32.xlu0 %v3303_v14, %s3187_s25  ;;  %2645 = vst.msk [vmem:[%s6371_s1 + $0x302] ss:$8 sm:$0xf0] %vm3_vm0, %v746_v38  }
  0xd3   :  { %1068 = vrot.lane.b32.xlu2 %v3310_v15, %s3187_s25 }
  0xd4   :  { %v683_v39 = vpop.permute.xlu1 %682   ;;  %v674_v40 = vpop.permute.xlu0 %673  }
  0xd5   :  { %2623 = vst.msk [vmem:[%s6371_s1 + $0x142] ss:$8 sm:$0xf] %vm3_vm0, %v683_v39   ;;  %v773_v41 = vpop.permute.xlu2 %772  }
  0xd6   :  { %2624 = vst.msk [vmem:[%s6371_s1 + $0x142] ss:$8 sm:$0xf0] %vm3_vm0, %v683_v39   ;;  %v4442_v39 = vld.sshfl [vmem:[%s6370_s0 + $0x44] sm:$0xff pattern:$0xb3a29180]  }
  0xd7   :  { %2620 = vst.msk [vmem:[%s6371_s1 + $0x102] ss:$8 sm:$0xf] %vm3_vm0, %v674_v40  }
  0xd8   :  { %2621 = vst.msk [vmem:[%s6371_s1 + $0x102] ss:$8 sm:$0xf0] %vm3_vm0, %v674_v40  }
  0xd9   :  { %2653 = vst.msk [vmem:[%s6371_s1 + $0x3c2] ss:$8 sm:$0xf] %vm3_vm0, %v773_v41  }
  0xda   :  { %1086 = vrot.lane.b32.xlu1 %v3336_v19, %s3187_s25  ;;  %1077 = vrot.lane.b32.xlu0 %v3324_v17, %s3187_s25  ;;  %2654 = vst.msk [vmem:[%s6371_s1 + $0x3c2] ss:$8 sm:$0xf0] %vm3_vm0, %v773_v41  }
  0xdb   :  { %1095 = vrot.lane.b32.xlu2 %v3331_v18, %s3187_s25 }
  0xdc   :  { %v710_v42 = vpop.permute.xlu1 %709   ;;  %v701_v43 = vpop.permute.xlu0 %700  }
  0xdd   :  { %2632 = vst.msk [vmem:[%s6371_s1 + $0x202] ss:$8 sm:$0xf] %vm3_vm0, %v710_v42   ;;  %v800_v44 = vpop.permute.xlu2 %799  }
  0xde   :  { %2633 = vst.msk [vmem:[%s6371_s1 + $0x202] ss:$8 sm:$0xf0] %vm3_vm0, %v710_v42   ;;  %v4455_v42 = vld.sshfl [vmem:[%s6370_s0 + $0x54] sm:$0xff pattern:$0xb3a29180]  }
  0xdf   :  { %2629 = vst.msk [vmem:[%s6371_s1 + $0x1c2] ss:$8 sm:$0xf] %vm3_vm0, %v701_v43  }
  0xe0   :  { %2630 = vst.msk [vmem:[%s6371_s1 + $0x1c2] ss:$8 sm:$0xf0] %vm3_vm0, %v701_v43   ;;  %v4466_v43 = vld.sshfl [vmem:[%s6370_s0 + $0x50] sm:$0xff pattern:$0xb3a29180]  }
  0xe1   :  { %2662 = vst.msk [vmem:[%s6371_s1 + $0x482] ss:$8 sm:$0xf] %vm3_vm0, %v800_v44  }
  0xe2   :  { %1113 = vrot.lane.b32.xlu1 %v3357_v22, %s3187_s25  ;;  %1104 = vrot.lane.b32.xlu0 %v3345_v20, %s3187_s25  ;;  %2663 = vst.msk [vmem:[%s6371_s1 + $0x482] ss:$8 sm:$0xf0] %vm3_vm0, %v800_v44  }
  0xe3   :  { %1122 = vrot.lane.b32.xlu2 %v3352_v21, %s3187_s25 }
  0xe4   :  { %v737_v45 = vpop.permute.xlu1 %736   ;;  %v728_v46 = vpop.permute.xlu0 %727  }
  0xe5   :  { %2641 = vst.msk [vmem:[%s6371_s1 + $0x2c2] ss:$8 sm:$0xf] %vm3_vm0, %v737_v45   ;;  %v827_v47 = vpop.permute.xlu2 %826  }
  0xe6   :  { %2642 = vst.msk [vmem:[%s6371_s1 + $0x2c2] ss:$8 sm:$0xf0] %vm3_vm0, %v737_v45   ;;  %v4487_v45 = vld.sshfl [vmem:[%s6370_s0 + $0x60] sm:$0xff pattern:$0xb3a29180]  }
  0xe7   :  { %2638 = vst.msk [vmem:[%s6371_s1 + $0x282] ss:$8 sm:$0xf] %vm3_vm0, %v728_v46  }
  0xe8   :  { %2639 = vst.msk [vmem:[%s6371_s1 + $0x282] ss:$8 sm:$0xf0] %vm3_vm0, %v728_v46  }
  0xe9   :  { %2671 = vst.msk [vmem:[%s6371_s1 + $0x542] ss:$8 sm:$0xf] %vm3_vm0, %v827_v47  }
  0xea   :  { %1140 = vrot.lane.b32.xlu1 %v3378_v25, %s3187_s25  ;;  %1131 = vrot.lane.b32.xlu0 %v3366_v23, %s3187_s25  ;;  %2672 = vst.msk [vmem:[%s6371_s1 + $0x542] ss:$8 sm:$0xf0] %vm3_vm0, %v827_v47  }
  0xeb   :  { %1149 = vrot.lane.b32.xlu2 %v3373_v24, %s3187_s25 }
  0xec   :  { %v764_v48 = vpop.permute.xlu1 %763   ;;  %v755_v49 = vpop.permute.xlu0 %754  }
  0xed   :  { %2650 = vst.msk [vmem:[%s6371_s1 + $0x382] ss:$8 sm:$0xf] %vm3_vm0, %v764_v48   ;;  %v854_v50 = vpop.permute.xlu2 %853  }
  0xee   :  { %2651 = vst.msk [vmem:[%s6371_s1 + $0x382] ss:$8 sm:$0xf0] %vm3_vm0, %v764_v48   ;;  %v4500_v48 = vld.sshfl [vmem:[%s6370_s0 + $0x70] sm:$0xff pattern:$0xb3a29180]  }
  0xef   :  { %2647 = vst.msk [vmem:[%s6371_s1 + $0x342] ss:$8 sm:$0xf] %vm3_vm0, %v755_v49  }
  0xf0   :  { %2648 = vst.msk [vmem:[%s6371_s1 + $0x342] ss:$8 sm:$0xf0] %vm3_vm0, %v755_v49   ;;  %v4511_v49 = vld.sshfl [vmem:[%s6370_s0 + $0x64] sm:$0xff pattern:$0xb3a29180]  }
  0xf1   :  { %2680 = vst.msk [vmem:[%s6371_s1 + $0x602] ss:$8 sm:$0xf] %vm3_vm0, %v854_v50  }
  0xf2   :  { %1167 = vrot.lane.b32.xlu1 %v3399_v28, %s3187_s25  ;;  %1158 = vrot.lane.b32.xlu0 %v3387_v26, %s3187_s25  ;;  %2681 = vst.msk [vmem:[%s6371_s1 + $0x602] ss:$8 sm:$0xf0] %vm3_vm0, %v854_v50  }
  0xf3   :  { %1176 = vrot.lane.b32.xlu2 %v3394_v27, %s3187_s25 }
  0xf4   :  { %v791_v51 = vpop.permute.xlu1 %790   ;;  %v782_v52 = vpop.permute.xlu0 %781  }
  0xf5   :  { %2659 = vst.msk [vmem:[%s6371_s1 + $0x442] ss:$8 sm:$0xf] %vm3_vm0, %v791_v51   ;;  %v881_v53 = vpop.permute.xlu2 %880  }
  0xf6   :  { %2660 = vst.msk [vmem:[%s6371_s1 + $0x442] ss:$8 sm:$0xf0] %vm3_vm0, %v791_v51   ;;  %v4532_v51 = vld.sshfl [vmem:[%s6370_s0 + $0x74] sm:$0xff pattern:$0xb3a29180]  }
  0xf7   :  { %2656 = vst.msk [vmem:[%s6371_s1 + $0x402] ss:$8 sm:$0xf] %vm3_vm0, %v782_v52  }
  0xf8   :  { %2657 = vst.msk [vmem:[%s6371_s1 + $0x402] ss:$8 sm:$0xf0] %vm3_vm0, %v782_v52  }
  0xf9   :  { %2689 = vst.msk [vmem:[%s6371_s1 + $0x6c2] ss:$8 sm:$0xf] %vm3_vm0, %v881_v53  }
  0xfa   :  { %1194 = vrot.lane.b32.xlu1 %v3420_v31, %s3187_s25  ;;  %1185 = vrot.lane.b32.xlu0 %v3408_v29, %s3187_s25  ;;  %2690 = vst.msk [vmem:[%s6371_s1 + $0x6c2] ss:$8 sm:$0xf0] %vm3_vm0, %v881_v53  }
  0xfb   :  { %1203 = vrot.lane.b32.xlu2 %v3415_v30, %s3187_s25 }
  0xfc   :  { %v818_v54 = vpop.permute.xlu1 %817   ;;  %v809_v55 = vpop.permute.xlu0 %808  }
  0xfd   :  { %2668 = vst.msk [vmem:[%s6371_s1 + $0x502] ss:$8 sm:$0xf] %vm3_vm0, %v818_v54   ;;  %v908_v56 = vpop.permute.xlu2 %907  }
  0xfe   :  { %2669 = vst.msk [vmem:[%s6371_s1 + $0x502] ss:$8 sm:$0xf0] %vm3_vm0, %v818_v54   ;;  %v4545_v54 = vld.sshfl [vmem:[%s6370_s0 + $0x84] sm:$0xff pattern:$0xb3a29180]  }
  0xff   :  { %2665 = vst.msk [vmem:[%s6371_s1 + $0x4c2] ss:$8 sm:$0xf] %vm3_vm0, %v809_v55  }
 0x100   :  { %2666 = vst.msk [vmem:[%s6371_s1 + $0x4c2] ss:$8 sm:$0xf0] %vm3_vm0, %v809_v55   ;;  %v4556_v55 = vld.sshfl [vmem:[%s6370_s0 + $0x80] sm:$0xff pattern:$0xb3a29180]  }
 0x101   :  { %2698 = vst.msk [vmem:[%s6371_s1 + $0x782] ss:$8 sm:$0xf] %vm3_vm0, %v908_v56  }
 0x102   :  { %1220 = vrot.lane.b32.xlu1 %v3231_v4, %s3188_s16  ;;  %1211 = vrot.lane.b32.xlu0 %v3210_v1, %s3188_s16  ;;  %2699 = vst.msk [vmem:[%s6371_s1 + $0x782] ss:$8 sm:$0xf0] %vm3_vm0, %v908_v56  }
 0x103   :  { %1229 = vrot.lane.b32.xlu2 %v3205_v0, %s3188_s16 }
 0x104   :  { %v845_v1 = vpop.permute.xlu1 %844   ;;  %v836_v57 = vpop.permute.xlu0 %835  }
 0x105   :  { %2677 = vst.msk [vmem:[%s6371_s1 + $0x5c2] ss:$8 sm:$0xf] %vm3_vm0, %v845_v1   ;;  %v934_v0 = vpop.permute.xlu2 %933  }
 0x106   :  { %2678 = vst.msk [vmem:[%s6371_s1 + $0x5c2] ss:$8 sm:$0xf0] %vm3_vm0, %v845_v1   ;;  %v4577_v1 = vld.sshfl [vmem:[%s6370_s0 + $0x90] sm:$0xff pattern:$0xb3a29180]  }
 0x107   :  { %2674 = vst.msk [vmem:[%s6371_s1 + $0x582] ss:$8 sm:$0xf] %vm3_vm0, %v836_v57  }
 0x108   :  { %2675 = vst.msk [vmem:[%s6371_s1 + $0x582] ss:$8 sm:$0xf0] %vm3_vm0, %v836_v57  }
 0x109   :  { %2706 = vst.msk [vmem:[%s6371_s1 + $0x43] ss:$8 sm:$0xf] %vm3_vm0, %v934_v0  }
 0x10a   :  { %1247 = vrot.lane.b32.xlu1 %v3219_v2, %s3188_s16  ;;  %1238 = vrot.lane.b32.xlu0 %v3226_v3, %s3188_s16  ;;  %2707 = vst.msk [vmem:[%s6371_s1 + $0x43] ss:$8 sm:$0xf0] %vm3_vm0, %v934_v0  }
 0x10b   :  { %1256 = vrot.lane.b32.xlu2 %v3240_v5, %s3188_s16 }
 0x10c   :  { %v872_v2 = vpop.permute.xlu1 %871   ;;  %v863_v3 = vpop.permute.xlu0 %862  }
 0x10d   :  { %2686 = vst.msk [vmem:[%s6371_s1 + $0x682] ss:$8 sm:$0xf] %vm3_vm0, %v872_v2   ;;  %v961_v58 = vpop.permute.xlu2 %960  }
 0x10e   :  { %2687 = vst.msk [vmem:[%s6371_s1 + $0x682] ss:$8 sm:$0xf0] %vm3_vm0, %v872_v2   ;;  %v4590_v2 = vld.sshfl [vmem:[%s6370_s0 + $0xa0] sm:$0xff pattern:$0xb3a29180]  }
 0x10f   :  { %2683 = vst.msk [vmem:[%s6371_s1 + $0x642] ss:$8 sm:$0xf] %vm3_vm0, %v863_v3  }
 0x110   :  { %2684 = vst.msk [vmem:[%s6371_s1 + $0x642] ss:$8 sm:$0xf0] %vm3_vm0, %v863_v3   ;;  %v4601_v3 = vld.sshfl [vmem:[%s6370_s0 + $0x94] sm:$0xff pattern:$0xb3a29180]  }
 0x111   :  { %2715 = vst.msk [vmem:[%s6371_s1 + $0x103] ss:$8 sm:$0xf] %vm3_vm0, %v961_v58  }
 0x112   :  { %1274 = vrot.lane.b32.xlu1 %v3247_v6, %s3188_s16  ;;  %1265 = vrot.lane.b32.xlu0 %v3252_v7, %s3188_s16  ;;  %2716 = vst.msk [vmem:[%s6371_s1 + $0x103] ss:$8 sm:$0xf0] %vm3_vm0, %v961_v58  }
 0x113   :  { %1283 = vrot.lane.b32.xlu2 %v3261_v8, %s3188_s16 }
 0x114   :  { %v899_v6 = vpop.permute.xlu1 %898   ;;  %v890_v7 = vpop.permute.xlu0 %889  }
 0x115   :  { %2695 = vst.msk [vmem:[%s6371_s1 + $0x742] ss:$8 sm:$0xf] %vm3_vm0, %v899_v6   ;;  %v988_v8 = vpop.permute.xlu2 %987  }
 0x116   :  { %2696 = vst.msk [vmem:[%s6371_s1 + $0x742] ss:$8 sm:$0xf0] %vm3_vm0, %v899_v6   ;;  %v4622_v6 = vld.sshfl [vmem:[%s6370_s0 + $0xa4] sm:$0xff pattern:$0xb3a29180]  }
 0x117   :  { %2692 = vst.msk [vmem:[%s6371_s1 + $0x702] ss:$8 sm:$0xf] %vm3_vm0, %v890_v7  }
 0x118   :  { %2693 = vst.msk [vmem:[%s6371_s1 + $0x702] ss:$8 sm:$0xf0] %vm3_vm0, %v890_v7  }
 0x119   :  { %2724 = vst.msk [vmem:[%s6371_s1 + $0x1c3] ss:$8 sm:$0xf] %vm3_vm0, %v988_v8  }
 0x11a   :  { %1301 = vrot.lane.b32.xlu1 %v3268_v9, %s3188_s16  ;;  %1292 = vrot.lane.b32.xlu0 %v3273_v10, %s3188_s16  ;;  %2725 = vst.msk [vmem:[%s6371_s1 + $0x1c3] ss:$8 sm:$0xf0] %vm3_vm0, %v988_v8  }
 0x11b   :  { %1310 = vrot.lane.b32.xlu2 %v3282_v11, %s3188_s16 }
 0x11c   :  { %v925_v9 = vpop.permute.xlu1 %924   ;;  %v917_v10 = vpop.permute.xlu0 %916  }
 0x11d   :  { %2703 = vst.msk [vmem:[%s6371_s1 + $0x3] ss:$8 sm:$0xf] %vm3_vm0, %v925_v9   ;;  %v1015_v11 = vpop.permute.xlu2 %1014  }
 0x11e   :  { %2704 = vst.msk [vmem:[%s6371_s1 + $0x3] ss:$8 sm:$0xf0] %vm3_vm0, %v925_v9   ;;  %v4635_v9 = vld.sshfl [vmem:[%s6370_s0 + $0xb4] sm:$0xff pattern:$0xb3a29180]  }
 0x11f   :  { %2701 = vst.msk [vmem:[%s6371_s1 + $0x7c2] ss:$8 sm:$0xf] %vm3_vm0, %v917_v10  }
 0x120   :  { %2702 = vst.msk [vmem:[%s6371_s1 + $0x7c2] ss:$8 sm:$0xf0] %vm3_vm0, %v917_v10   ;;  %v4646_v10 = vld.sshfl [vmem:[%s6370_s0 + $0xb0] sm:$0xff pattern:$0xb3a29180]  }
 0x121   :  { %2733 = vst.msk [vmem:[%s6371_s1 + $0x283] ss:$8 sm:$0xf] %vm3_vm0, %v1015_v11  }
 0x122   :  { %1328 = vrot.lane.b32.xlu1 %v3289_v12, %s3188_s16  ;;  %1319 = vrot.lane.b32.xlu0 %v3294_v13, %s3188_s16  ;;  %2734 = vst.msk [vmem:[%s6371_s1 + $0x283] ss:$8 sm:$0xf0] %vm3_vm0, %v1015_v11  }
 0x123   :  { %1337 = vrot.lane.b32.xlu2 %v3303_v14, %s3188_s16 }
 0x124   :  { %v952_v12 = vpop.permute.xlu1 %951   ;;  %v943_v13 = vpop.permute.xlu0 %942  }
 0x125   :  { %2712 = vst.msk [vmem:[%s6371_s1 + $0xc3] ss:$8 sm:$0xf] %vm3_vm0, %v952_v12   ;;  %v1042_v14 = vpop.permute.xlu2 %1041  }
 0x126   :  { %2713 = vst.msk [vmem:[%s6371_s1 + $0xc3] ss:$8 sm:$0xf0] %vm3_vm0, %v952_v12   ;;  %v4667_v12 = vld.sshfl [vmem:[%s6370_s0 + $0xc0] sm:$0xff pattern:$0xb3a29180]  }
 0x127   :  { %2709 = vst.msk [vmem:[%s6371_s1 + $0x83] ss:$8 sm:$0xf] %vm3_vm0, %v943_v13  }
 0x128   :  { %2710 = vst.msk [vmem:[%s6371_s1 + $0x83] ss:$8 sm:$0xf0] %vm3_vm0, %v943_v13  }
 0x129   :  { %2742 = vst.msk [vmem:[%s6371_s1 + $0x343] ss:$8 sm:$0xf] %vm3_vm0, %v1042_v14  }
 0x12a   :  { %1355 = vrot.lane.b32.xlu1 %v3310_v15, %s3188_s16  ;;  %1346 = vrot.lane.b32.xlu0 %v3315_v16, %s3188_s16  ;;  %2743 = vst.msk [vmem:[%s6371_s1 + $0x343] ss:$8 sm:$0xf0] %vm3_vm0, %v1042_v14  }
 0x12b   :  { %1364 = vrot.lane.b32.xlu2 %v3324_v17, %s3188_s16 }
 0x12c   :  { %v979_v15 = vpop.permute.xlu1 %978   ;;  %v970_v16 = vpop.permute.xlu0 %969  }
 0x12d   :  { %2721 = vst.msk [vmem:[%s6371_s1 + $0x183] ss:$8 sm:$0xf] %vm3_vm0, %v979_v15   ;;  %v1069_v17 = vpop.permute.xlu2 %1068  }
 0x12e   :  { %2722 = vst.msk [vmem:[%s6371_s1 + $0x183] ss:$8 sm:$0xf0] %vm3_vm0, %v979_v15   ;;  %v4680_v15 = vld.sshfl [vmem:[%s6370_s0 + $0xd0] sm:$0xff pattern:$0xb3a29180]  }
 0x12f   :  { %2718 = vst.msk [vmem:[%s6371_s1 + $0x143] ss:$8 sm:$0xf] %vm3_vm0, %v970_v16  }
 0x130   :  { %2719 = vst.msk [vmem:[%s6371_s1 + $0x143] ss:$8 sm:$0xf0] %vm3_vm0, %v970_v16   ;;  %v4691_v16 = vld.sshfl [vmem:[%s6370_s0 + $0xc4] sm:$0xff pattern:$0xb3a29180]  }
 0x131   :  { %2751 = vst.msk [vmem:[%s6371_s1 + $0x403] ss:$8 sm:$0xf] %vm3_vm0, %v1069_v17  }
 0x132   :  { %1382 = vrot.lane.b32.xlu1 %v3331_v18, %s3188_s16  ;;  %1373 = vrot.lane.b32.xlu0 %v3336_v19, %s3188_s16  ;;  %2752 = vst.msk [vmem:[%s6371_s1 + $0x403] ss:$8 sm:$0xf0] %vm3_vm0, %v1069_v17  }
 0x133   :  { %1391 = vrot.lane.b32.xlu2 %v3345_v20, %s3188_s16 }
 0x134   :  { %v1006_v18 = vpop.permute.xlu1 %1005   ;;  %v997_v19 = vpop.permute.xlu0 %996  }
 0x135   :  { %2730 = vst.msk [vmem:[%s6371_s1 + $0x243] ss:$8 sm:$0xf] %vm3_vm0, %v1006_v18   ;;  %v1096_v20 = vpop.permute.xlu2 %1095  }
 0x136   :  { %2731 = vst.msk [vmem:[%s6371_s1 + $0x243] ss:$8 sm:$0xf0] %vm3_vm0, %v1006_v18   ;;  %v4712_v18 = vld.sshfl [vmem:[%s6370_s0 + $0xd4] sm:$0xff pattern:$0xb3a29180]  }
 0x137   :  { %2727 = vst.msk [vmem:[%s6371_s1 + $0x203] ss:$8 sm:$0xf] %vm3_vm0, %v997_v19  }
 0x138   :  { %2728 = vst.msk [vmem:[%s6371_s1 + $0x203] ss:$8 sm:$0xf0] %vm3_vm0, %v997_v19  }
 0x139   :  { %2760 = vst.msk [vmem:[%s6371_s1 + $0x4c3] ss:$8 sm:$0xf] %vm3_vm0, %v1096_v20  }
 0x13a   :  { %1409 = vrot.lane.b32.xlu1 %v3352_v21, %s3188_s16  ;;  %1400 = vrot.lane.b32.xlu0 %v3357_v22, %s3188_s16  ;;  %2761 = vst.msk [vmem:[%s6371_s1 + $0x4c3] ss:$8 sm:$0xf0] %vm3_vm0, %v1096_v20  }
 0x13b   :  { %1418 = vrot.lane.b32.xlu2 %v3366_v23, %s3188_s16 }
 0x13c   :  { %v1033_v21 = vpop.permute.xlu1 %1032   ;;  %v1024_v22 = vpop.permute.xlu0 %1023  }
 0x13d   :  { %2739 = vst.msk [vmem:[%s6371_s1 + $0x303] ss:$8 sm:$0xf] %vm3_vm0, %v1033_v21   ;;  %v1123_v23 = vpop.permute.xlu2 %1122  }
 0x13e   :  { %2740 = vst.msk [vmem:[%s6371_s1 + $0x303] ss:$8 sm:$0xf0] %vm3_vm0, %v1033_v21   ;;  %v4725_v21 = vld.sshfl [vmem:[%s6370_s0 + $0xe4] sm:$0xff pattern:$0xb3a29180]  }
 0x13f   :  { %2736 = vst.msk [vmem:[%s6371_s1 + $0x2c3] ss:$8 sm:$0xf] %vm3_vm0, %v1024_v22  }
 0x140   :  { %2737 = vst.msk [vmem:[%s6371_s1 + $0x2c3] ss:$8 sm:$0xf0] %vm3_vm0, %v1024_v22   ;;  %v4736_v22 = vld.sshfl [vmem:[%s6370_s0 + $0xe0] sm:$0xff pattern:$0xb3a29180]  }
 0x141   :  { %2769 = vst.msk [vmem:[%s6371_s1 + $0x583] ss:$8 sm:$0xf] %vm3_vm0, %v1123_v23  }
 0x142   :  { %1436 = vrot.lane.b32.xlu1 %v3373_v24, %s3188_s16  ;;  %1427 = vrot.lane.b32.xlu0 %v3378_v25, %s3188_s16  ;;  %2770 = vst.msk [vmem:[%s6371_s1 + $0x583] ss:$8 sm:$0xf0] %vm3_vm0, %v1123_v23  }
 0x143   :  { %1445 = vrot.lane.b32.xlu2 %v3387_v26, %s3188_s16 }
 0x144   :  { %v1060_v24 = vpop.permute.xlu1 %1059   ;;  %v1051_v25 = vpop.permute.xlu0 %1050  }
 0x145   :  { %2748 = vst.msk [vmem:[%s6371_s1 + $0x3c3] ss:$8 sm:$0xf] %vm3_vm0, %v1060_v24   ;;  %v1150_v26 = vpop.permute.xlu2 %1149  }
 0x146   :  { %2749 = vst.msk [vmem:[%s6371_s1 + $0x3c3] ss:$8 sm:$0xf0] %vm3_vm0, %v1060_v24   ;;  %v4757_v24 = vld.sshfl [vmem:[%s6370_s0 + $0xf0] sm:$0xff pattern:$0xb3a29180]  }
 0x147   :  { %2745 = vst.msk [vmem:[%s6371_s1 + $0x383] ss:$8 sm:$0xf] %vm3_vm0, %v1051_v25  }
 0x148   :  { %2746 = vst.msk [vmem:[%s6371_s1 + $0x383] ss:$8 sm:$0xf0] %vm3_vm0, %v1051_v25  }
 0x149   :  { %2778 = vst.msk [vmem:[%s6371_s1 + $0x643] ss:$8 sm:$0xf] %vm3_vm0, %v1150_v26  }
 0x14a   :  { %1463 = vrot.lane.b32.xlu1 %v3394_v27, %s3188_s16  ;;  %1454 = vrot.lane.b32.xlu0 %v3399_v28, %s3188_s16  ;;  %2779 = vst.msk [vmem:[%s6371_s1 + $0x643] ss:$8 sm:$0xf0] %vm3_vm0, %v1150_v26  }
 0x14b   :  { %1472 = vrot.lane.b32.xlu2 %v3408_v29, %s3188_s16 }
 0x14c   :  { %v1087_v27 = vpop.permute.xlu1 %1086   ;;  %v1078_v28 = vpop.permute.xlu0 %1077  }
 0x14d   :  { %2757 = vst.msk [vmem:[%s6371_s1 + $0x483] ss:$8 sm:$0xf] %vm3_vm0, %v1087_v27   ;;  %v1177_v29 = vpop.permute.xlu2 %1176  }
 0x14e   :  { %2758 = vst.msk [vmem:[%s6371_s1 + $0x483] ss:$8 sm:$0xf0] %vm3_vm0, %v1087_v27   ;;  %v4776_v27 = vld.sshfl [vmem:[%s6370_s0 + $0xf4] sm:$0xff pattern:$0xb3a29180]  }
 0x14f   :  { %2754 = vst.msk [vmem:[%s6371_s1 + $0x443] ss:$8 sm:$0xf] %vm3_vm0, %v1078_v28  }
 0x150   :  { %2755 = vst.msk [vmem:[%s6371_s1 + $0x443] ss:$8 sm:$0xf0] %vm3_vm0, %v1078_v28  }
 0x151   :  { %2787 = vst.msk [vmem:[%s6371_s1 + $0x703] ss:$8 sm:$0xf] %vm3_vm0, %v1177_v29  }
 0x152   :  { %1490 = vrot.lane.b32.xlu1 %v3415_v30, %s3188_s16  ;;  %1481 = vrot.lane.b32.xlu0 %v3420_v31, %s3188_s16  ;;  %2788 = vst.msk [vmem:[%s6371_s1 + $0x703] ss:$8 sm:$0xf0] %vm3_vm0, %v1177_v29   ;;  %v4317_v30 = vld.sshfl [vmem:[%s6370_s0] sm:$0xff pattern:$0xb3a29180]  }
 0x153   :  { %1498 = vrot.lane.b32.xlu2 %v4317_v30, %s3189_s3  ;;  %v4797_v29 = vld.sshfl [vmem:[%s6370_s0 + $0x4] sm:$0xff pattern:$0xb3a29180]  }
 0x154   :  { %v1114_v31 = vpop.permute.xlu1 %1113   ;;  %v1105_v59 = vpop.permute.xlu0 %1104  }
 0x155   :  { %2766 = vst.msk [vmem:[%s6371_s1 + $0x543] ss:$8 sm:$0xf] %vm3_vm0, %v1114_v31   ;;  %v1204_v61 = vpop.permute.xlu2 %1203  }
 0x156   :  { %2767 = vst.msk [vmem:[%s6371_s1 + $0x543] ss:$8 sm:$0xf0] %vm3_vm0, %v1114_v31  }
 0x157   :  { %2763 = vst.msk [vmem:[%s6371_s1 + $0x503] ss:$8 sm:$0xf] %vm3_vm0, %v1105_v59  }
 0x158   :  { %2764 = vst.msk [vmem:[%s6371_s1 + $0x503] ss:$8 sm:$0xf0] %vm3_vm0, %v1105_v59  }
 0x159   :  { %2796 = vst.msk [vmem:[%s6371_s1 + $0x7c3] ss:$8 sm:$0xf] %vm3_vm0, %v1204_v61  }
 0x15a   :  { %1516 = vrot.lane.b32.xlu1 %v4336_v60, %s3189_s3  ;;  %1507 = vrot.lane.b32.xlu0 %v3231_v4, %s3189_s3  ;;  %2797 = vst.msk [vmem:[%s6371_s1 + $0x7c3] ss:$8 sm:$0xf0] %vm3_vm0, %v1204_v61   ;;  %v4357_v4 = vld.sshfl [vmem:[%s6370_s0 + $0x14] sm:$0xff pattern:$0xb3a29180]  }
 0x15b   :  { %1525 = vrot.lane.b32.xlu2 %v4357_v4, %s3189_s3 }
 0x15c   :  { %v1141_v62 = vpop.permute.xlu1 %1140   ;;  %v1132_v63 = vpop.permute.xlu0 %1131  }
 0x15d   :  { %2775 = vst.msk [vmem:[%s6371_s1 + $0x603] ss:$8 sm:$0xf] %vm3_vm0, %v1141_v62   ;;  %v1230_v33 = vpop.permute.xlu2 %1229  }
 0x15e   :  { %2776 = vst.msk [vmem:[%s6371_s1 + $0x603] ss:$8 sm:$0xf0] %vm3_vm0, %v1141_v62  }
 0x15f   :  { %2772 = vst.msk [vmem:[%s6371_s1 + $0x5c3] ss:$8 sm:$0xf] %vm3_vm0, %v1132_v63  }
 0x160   :  { %2773 = vst.msk [vmem:[%s6371_s1 + $0x5c3] ss:$8 sm:$0xf0] %vm3_vm0, %v1132_v63  }
 0x161   :  { %2804 = vst.msk [vmem:[%s6371_s1 + $0x84] ss:$8 sm:$0xf] %vm3_vm0, %v1230_v33  }
 0x162   :  { %1543 = vrot.lane.b32.xlu1 %v3240_v5, %s3189_s3  ;;  %1534 = vrot.lane.b32.xlu0 %v4376_v32, %s3189_s3  ;;  %2805 = vst.msk [vmem:[%s6371_s1 + $0x84] ss:$8 sm:$0xf0] %vm3_vm0, %v1230_v33   ;;  %v4397_v5 = vld.sshfl [vmem:[%s6370_s0 + $0x30] sm:$0xff pattern:$0xb3a29180]  }
 0x163   :  { %1552 = vrot.lane.b32.xlu2 %v4397_v5, %s3189_s3  ;;  %v4846_v33 = vld.sshfl [vmem:[%s6370_s0 + $0x24] sm:$0xff pattern:$0xb3a29180]  }
 0x164   :  { %v1168_v34 = vpop.permute.xlu1 %1167   ;;  %v1159_v35 = vpop.permute.xlu0 %1158  }
 0x165   :  { %2784 = vst.msk [vmem:[%s6371_s1 + $0x6c3] ss:$8 sm:$0xf] %vm3_vm0, %v1168_v34   ;;  %v1257_v38 = vpop.permute.xlu2 %1256  }
 0x166   :  { %2785 = vst.msk [vmem:[%s6371_s1 + $0x6c3] ss:$8 sm:$0xf0] %vm3_vm0, %v1168_v34  }
 0x167   :  { %2781 = vst.msk [vmem:[%s6371_s1 + $0x683] ss:$8 sm:$0xf] %vm3_vm0, %v1159_v35  }
 0x168   :  { %2782 = vst.msk [vmem:[%s6371_s1 + $0x683] ss:$8 sm:$0xf0] %vm3_vm0, %v1159_v35  }
 0x169   :  { %2813 = vst.msk [vmem:[%s6371_s1 + $0x144] ss:$8 sm:$0xf] %vm3_vm0, %v1257_v38  }
 0x16a   :  { %1570 = vrot.lane.b32.xlu1 %v4410_v36, %s3189_s3  ;;  %1561 = vrot.lane.b32.xlu0 %v4421_v37, %s3189_s3  ;;  %2814 = vst.msk [vmem:[%s6371_s1 + $0x144] ss:$8 sm:$0xf0] %vm3_vm0, %v1257_v38  }
 0x16b   :  { %1579 = vrot.lane.b32.xlu2 %v4442_v39, %s3189_s3 }
 0x16c   :  { %v1195_v40 = vpop.permute.xlu1 %1194   ;;  %v1186_v41 = vpop.permute.xlu0 %1185  }
 0x16d   :  { %2793 = vst.msk [vmem:[%s6371_s1 + $0x783] ss:$8 sm:$0xf] %vm3_vm0, %v1195_v40   ;;  %v1284_v44 = vpop.permute.xlu2 %1283  }
 0x16e   :  { %2794 = vst.msk [vmem:[%s6371_s1 + $0x783] ss:$8 sm:$0xf0] %vm3_vm0, %v1195_v40  }
 0x16f   :  { %2790 = vst.msk [vmem:[%s6371_s1 + $0x743] ss:$8 sm:$0xf] %vm3_vm0, %v1186_v41  }
 0x170   :  { %2791 = vst.msk [vmem:[%s6371_s1 + $0x743] ss:$8 sm:$0xf0] %vm3_vm0, %v1186_v41  }
 0x171   :  { %2822 = vst.msk [vmem:[%s6371_s1 + $0x204] ss:$8 sm:$0xf] %vm3_vm0, %v1284_v44  }
 0x172   :  { %1597 = vrot.lane.b32.xlu1 %v4455_v42, %s3189_s3  ;;  %1588 = vrot.lane.b32.xlu0 %v4466_v43, %s3189_s3  ;;  %2823 = vst.msk [vmem:[%s6371_s1 + $0x204] ss:$8 sm:$0xf0] %vm3_vm0, %v1284_v44  }
 0x173   :  { %1606 = vrot.lane.b32.xlu2 %v4487_v45, %s3189_s3 }
 0x174   :  { %v1221_v46 = vpop.permute.xlu1 %1220   ;;  %v1212_v47 = vpop.permute.xlu0 %1211  }
 0x175   :  { %2801 = vst.msk [vmem:[%s6371_s1 + $0x44] ss:$8 sm:$0xf] %vm3_vm0, %v1221_v46   ;;  %v1311_v50 = vpop.permute.xlu2 %1310  }
 0x176   :  { %2802 = vst.msk [vmem:[%s6371_s1 + $0x44] ss:$8 sm:$0xf0] %vm3_vm0, %v1221_v46  }
 0x177   :  { %2798 = vst.msk [vmem:[%s6371_s1 + $0x4] ss:$8 sm:$0xf] %vm3_vm0, %v1212_v47  }
 0x178   :  { %2799 = vst.msk [vmem:[%s6371_s1 + $0x4] ss:$8 sm:$0xf0] %vm3_vm0, %v1212_v47  }
 0x179   :  { %2831 = vst.msk [vmem:[%s6371_s1 + $0x2c4] ss:$8 sm:$0xf] %vm3_vm0, %v1311_v50  }
 0x17a   :  { %1624 = vrot.lane.b32.xlu1 %v4500_v48, %s3189_s3  ;;  %1615 = vrot.lane.b32.xlu0 %v4511_v49, %s3189_s3  ;;  %2832 = vst.msk [vmem:[%s6371_s1 + $0x2c4] ss:$8 sm:$0xf0] %vm3_vm0, %v1311_v50  }
 0x17b   :  { %1633 = vrot.lane.b32.xlu2 %v4532_v51, %s3189_s3 }
 0x17c   :  { %v1248_v52 = vpop.permute.xlu1 %1247   ;;  %v1239_v53 = vpop.permute.xlu0 %1238  }
 0x17d   :  { %2810 = vst.msk [vmem:[%s6371_s1 + $0x104] ss:$8 sm:$0xf] %vm3_vm0, %v1248_v52   ;;  %v1338_v56 = vpop.permute.xlu2 %1337  }
 0x17e   :  { %2811 = vst.msk [vmem:[%s6371_s1 + $0x104] ss:$8 sm:$0xf0] %vm3_vm0, %v1248_v52  }
 0x17f   :  { %2807 = vst.msk [vmem:[%s6371_s1 + $0xc4] ss:$8 sm:$0xf] %vm3_vm0, %v1239_v53  }
 0x180   :  { %2808 = vst.msk [vmem:[%s6371_s1 + $0xc4] ss:$8 sm:$0xf0] %vm3_vm0, %v1239_v53  }
 0x181   :  { %2840 = vst.msk [vmem:[%s6371_s1 + $0x384] ss:$8 sm:$0xf] %vm3_vm0, %v1338_v56  }
 0x182   :  { %1651 = vrot.lane.b32.xlu1 %v4545_v54, %s3189_s3  ;;  %1642 = vrot.lane.b32.xlu0 %v4556_v55, %s3189_s3  ;;  %2841 = vst.msk [vmem:[%s6371_s1 + $0x384] ss:$8 sm:$0xf0] %vm3_vm0, %v1338_v56  }
 0x183   :  { %1660 = vrot.lane.b32.xlu2 %v4577_v1, %s3189_s3 }
 0x184   :  { %v1275_v57 = vpop.permute.xlu1 %1274   ;;  %v1266_v0 = vpop.permute.xlu0 %1265  }
 0x185   :  { %2819 = vst.msk [vmem:[%s6371_s1 + $0x1c4] ss:$8 sm:$0xf] %vm3_vm0, %v1275_v57   ;;  %v1365_v58 = vpop.permute.xlu2 %1364  }
 0x186   :  { %2820 = vst.msk [vmem:[%s6371_s1 + $0x1c4] ss:$8 sm:$0xf0] %vm3_vm0, %v1275_v57  }
 0x187   :  { %2816 = vst.msk [vmem:[%s6371_s1 + $0x184] ss:$8 sm:$0xf] %vm3_vm0, %v1266_v0  }
 0x188   :  { %2817 = vst.msk [vmem:[%s6371_s1 + $0x184] ss:$8 sm:$0xf0] %vm3_vm0, %v1266_v0  }
 0x189   :  { %2849 = vst.msk [vmem:[%s6371_s1 + $0x444] ss:$8 sm:$0xf] %vm3_vm0, %v1365_v58  }
 0x18a   :  { %1678 = vrot.lane.b32.xlu1 %v4590_v2, %s3189_s3  ;;  %1669 = vrot.lane.b32.xlu0 %v4601_v3, %s3189_s3  ;;  %2850 = vst.msk [vmem:[%s6371_s1 + $0x444] ss:$8 sm:$0xf0] %vm3_vm0, %v1365_v58  }
 0x18b   :  { %1687 = vrot.lane.b32.xlu2 %v4622_v6, %s3189_s3 }
 0x18c   :  { %v1302_v7 = vpop.permute.xlu1 %1301   ;;  %v1293_v8 = vpop.permute.xlu0 %1292  }
 0x18d   :  { %2828 = vst.msk [vmem:[%s6371_s1 + $0x284] ss:$8 sm:$0xf] %vm3_vm0, %v1302_v7   ;;  %v1392_v11 = vpop.permute.xlu2 %1391  }
 0x18e   :  { %2829 = vst.msk [vmem:[%s6371_s1 + $0x284] ss:$8 sm:$0xf0] %vm3_vm0, %v1302_v7  }
 0x18f   :  { %2825 = vst.msk [vmem:[%s6371_s1 + $0x244] ss:$8 sm:$0xf] %vm3_vm0, %v1293_v8  }
 0x190   :  { %2826 = vst.msk [vmem:[%s6371_s1 + $0x244] ss:$8 sm:$0xf0] %vm3_vm0, %v1293_v8  }
 0x191   :  { %2858 = vst.msk [vmem:[%s6371_s1 + $0x504] ss:$8 sm:$0xf] %vm3_vm0, %v1392_v11  }
 0x192   :  { %1705 = vrot.lane.b32.xlu1 %v4635_v9, %s3189_s3  ;;  %1696 = vrot.lane.b32.xlu0 %v4646_v10, %s3189_s3  ;;  %2859 = vst.msk [vmem:[%s6371_s1 + $0x504] ss:$8 sm:$0xf0] %vm3_vm0, %v1392_v11  }
 0x193   :  { %1714 = vrot.lane.b32.xlu2 %v4667_v12, %s3189_s3 }
 0x194   :  { %v1329_v13 = vpop.permute.xlu1 %1328   ;;  %v1320_v14 = vpop.permute.xlu0 %1319  }
 0x195   :  { %2837 = vst.msk [vmem:[%s6371_s1 + $0x344] ss:$8 sm:$0xf] %vm3_vm0, %v1329_v13   ;;  %v1419_v17 = vpop.permute.xlu2 %1418  }
 0x196   :  { %2838 = vst.msk [vmem:[%s6371_s1 + $0x344] ss:$8 sm:$0xf0] %vm3_vm0, %v1329_v13  }
 0x197   :  { %2834 = vst.msk [vmem:[%s6371_s1 + $0x304] ss:$8 sm:$0xf] %vm3_vm0, %v1320_v14  }
 0x198   :  { %2835 = vst.msk [vmem:[%s6371_s1 + $0x304] ss:$8 sm:$0xf0] %vm3_vm0, %v1320_v14  }
 0x199   :  { %2867 = vst.msk [vmem:[%s6371_s1 + $0x5c4] ss:$8 sm:$0xf] %vm3_vm0, %v1419_v17  }
 0x19a   :  { %1732 = vrot.lane.b32.xlu1 %v4680_v15, %s3189_s3  ;;  %1723 = vrot.lane.b32.xlu0 %v4691_v16, %s3189_s3  ;;  %2868 = vst.msk [vmem:[%s6371_s1 + $0x5c4] ss:$8 sm:$0xf0] %vm3_vm0, %v1419_v17  }
 0x19b   :  { %1741 = vrot.lane.b32.xlu2 %v4712_v18, %s3189_s3 }
 0x19c   :  { %v1356_v19 = vpop.permute.xlu1 %1355   ;;  %v1347_v20 = vpop.permute.xlu0 %1346  }
 0x19d   :  { %2846 = vst.msk [vmem:[%s6371_s1 + $0x404] ss:$8 sm:$0xf] %vm3_vm0, %v1356_v19   ;;  %v1446_v23 = vpop.permute.xlu2 %1445  }
 0x19e   :  { %2847 = vst.msk [vmem:[%s6371_s1 + $0x404] ss:$8 sm:$0xf0] %vm3_vm0, %v1356_v19  }
 0x19f   :  { %2843 = vst.msk [vmem:[%s6371_s1 + $0x3c4] ss:$8 sm:$0xf] %vm3_vm0, %v1347_v20  }
 0x1a0   :  { %2844 = vst.msk [vmem:[%s6371_s1 + $0x3c4] ss:$8 sm:$0xf0] %vm3_vm0, %v1347_v20  }
 0x1a1   :  { %2876 = vst.msk [vmem:[%s6371_s1 + $0x684] ss:$8 sm:$0xf] %vm3_vm0, %v1446_v23  }
 0x1a2   :  { %1759 = vrot.lane.b32.xlu1 %v4725_v21, %s3189_s3  ;;  %1750 = vrot.lane.b32.xlu0 %v4736_v22, %s3189_s3  ;;  %2877 = vst.msk [vmem:[%s6371_s1 + $0x684] ss:$8 sm:$0xf0] %vm3_vm0, %v1446_v23  }
 0x1a3   :  { %1768 = vrot.lane.b32.xlu2 %v4757_v24, %s3189_s3 }
 0x1a4   :  { %v1383_v25 = vpop.permute.xlu1 %1382   ;;  %v1374_v26 = vpop.permute.xlu0 %1373  }
 0x1a5   :  { %2855 = vst.msk [vmem:[%s6371_s1 + $0x4c4] ss:$8 sm:$0xf] %vm3_vm0, %v1383_v25   ;;  %v1473_v28 = vpop.permute.xlu2 %1472  }
 0x1a6   :  { %2856 = vst.msk [vmem:[%s6371_s1 + $0x4c4] ss:$8 sm:$0xf0] %vm3_vm0, %v1383_v25  }
 0x1a7   :  { %2852 = vst.msk [vmem:[%s6371_s1 + $0x484] ss:$8 sm:$0xf] %vm3_vm0, %v1374_v26  }
 0x1a8   :  { %2853 = vst.msk [vmem:[%s6371_s1 + $0x484] ss:$8 sm:$0xf0] %vm3_vm0, %v1374_v26  }
 0x1a9   :  { %2885 = vst.msk [vmem:[%s6371_s1 + $0x744] ss:$8 sm:$0xf] %vm3_vm0, %v1473_v28  }
 0x1aa   :  { %1785 = vrot.lane.b32.xlu1 %v4317_v30, %s3190_s21  ;;  %1777 = vrot.lane.b32.xlu0 %v4776_v27, %s3189_s3  ;;  %2886 = vst.msk [vmem:[%s6371_s1 + $0x744] ss:$8 sm:$0xf0] %vm3_vm0, %v1473_v28  }
 0x1ab   :  { %1794 = vrot.lane.b32.xlu2 %v4797_v29, %s3190_s21 }
 0x1ac   :  { %v1410_v31 = vpop.permute.xlu1 %1409   ;;  %v1401_v59 = vpop.permute.xlu0 %1400  }
 0x1ad   :  { %2864 = vst.msk [vmem:[%s6371_s1 + $0x584] ss:$8 sm:$0xf] %vm3_vm0, %v1410_v31   ;;  %v1499_v61 = vpop.permute.xlu2 %1498  }
 0x1ae   :  { %2865 = vst.msk [vmem:[%s6371_s1 + $0x584] ss:$8 sm:$0xf0] %vm3_vm0, %v1410_v31  }
 0x1af   :  { %2861 = vst.msk [vmem:[%s6371_s1 + $0x544] ss:$8 sm:$0xf] %vm3_vm0, %v1401_v59  }
 0x1b0   :  { %2862 = vst.msk [vmem:[%s6371_s1 + $0x544] ss:$8 sm:$0xf0] %vm3_vm0, %v1401_v59  }
 0x1b1   :  { %2893 = vst.msk [vmem:[%s6371_s1 + $0x5] ss:$8 sm:$0xf] %vm3_vm0, %v1499_v61  }
 0x1b2   :  { %1812 = vrot.lane.b32.xlu1 %v4357_v4, %s3190_s21  ;;  %1803 = vrot.lane.b32.xlu0 %v4336_v60, %s3190_s21  ;;  %2894 = vst.msk [vmem:[%s6371_s1 + $0x5] ss:$8 sm:$0xf0] %vm3_vm0, %v1499_v61  }
 0x1b3   :  { %1821 = vrot.lane.b32.xlu2 %v4376_v32, %s3190_s21 }
 0x1b4   :  { %v1437_v62 = vpop.permute.xlu1 %1436   ;;  %v1428_v63 = vpop.permute.xlu0 %1427  }
 0x1b5   :  { %2873 = vst.msk [vmem:[%s6371_s1 + $0x644] ss:$8 sm:$0xf] %vm3_vm0, %v1437_v62   ;;  %v1526_v34 = vpop.permute.xlu2 %1525  }
 0x1b6   :  { %2874 = vst.msk [vmem:[%s6371_s1 + $0x644] ss:$8 sm:$0xf0] %vm3_vm0, %v1437_v62  }
 0x1b7   :  { %2870 = vst.msk [vmem:[%s6371_s1 + $0x604] ss:$8 sm:$0xf] %vm3_vm0, %v1428_v63  }
 0x1b8   :  { %2871 = vst.msk [vmem:[%s6371_s1 + $0x604] ss:$8 sm:$0xf0] %vm3_vm0, %v1428_v63  }
 0x1b9   :  { %2902 = vst.msk [vmem:[%s6371_s1 + $0xc5] ss:$8 sm:$0xf] %vm3_vm0, %v1526_v34  }
 0x1ba   :  { %1839 = vrot.lane.b32.xlu1 %v4397_v5, %s3190_s21  ;;  %1830 = vrot.lane.b32.xlu0 %v4846_v33, %s3190_s21  ;;  %2903 = vst.msk [vmem:[%s6371_s1 + $0xc5] ss:$8 sm:$0xf0] %vm3_vm0, %v1526_v34  }
 0x1bb   :  { %1848 = vrot.lane.b32.xlu2 %v4421_v37, %s3190_s21 }
 0x1bc   :  { %v1464_v35 = vpop.permute.xlu1 %1463   ;;  %v1455_v38 = vpop.permute.xlu0 %1454  }
 0x1bd   :  { %2882 = vst.msk [vmem:[%s6371_s1 + $0x704] ss:$8 sm:$0xf] %vm3_vm0, %v1464_v35   ;;  %v1553_v40 = vpop.permute.xlu2 %1552  }
 0x1be   :  { %2883 = vst.msk [vmem:[%s6371_s1 + $0x704] ss:$8 sm:$0xf0] %vm3_vm0, %v1464_v35  }
 0x1bf   :  { %2879 = vst.msk [vmem:[%s6371_s1 + $0x6c4] ss:$8 sm:$0xf] %vm3_vm0, %v1455_v38  }
 0x1c0   :  { %2880 = vst.msk [vmem:[%s6371_s1 + $0x6c4] ss:$8 sm:$0xf0] %vm3_vm0, %v1455_v38  }
 0x1c1   :  { %2911 = vst.msk [vmem:[%s6371_s1 + $0x185] ss:$8 sm:$0xf] %vm3_vm0, %v1553_v40  }
 0x1c2   :  { %1866 = vrot.lane.b32.xlu1 %v4442_v39, %s3190_s21  ;;  %1857 = vrot.lane.b32.xlu0 %v4410_v36, %s3190_s21  ;;  %2912 = vst.msk [vmem:[%s6371_s1 + $0x185] ss:$8 sm:$0xf0] %vm3_vm0, %v1553_v40  }
 0x1c3   :  { %1875 = vrot.lane.b32.xlu2 %v4466_v43, %s3190_s21 }
 0x1c4   :  { %v1491_v41 = vpop.permute.xlu1 %1490   ;;  %v1482_v44 = vpop.permute.xlu0 %1481  }
 0x1c5   :  { %2891 = vst.msk [vmem:[%s6371_s1 + $0x7c4] ss:$8 sm:$0xf] %vm3_vm0, %v1491_v41   ;;  %v1580_v46 = vpop.permute.xlu2 %1579  }
 0x1c6   :  { %2892 = vst.msk [vmem:[%s6371_s1 + $0x7c4] ss:$8 sm:$0xf0] %vm3_vm0, %v1491_v41  }
 0x1c7   :  { %2888 = vst.msk [vmem:[%s6371_s1 + $0x784] ss:$8 sm:$0xf] %vm3_vm0, %v1482_v44  }
 0x1c8   :  { %2889 = vst.msk [vmem:[%s6371_s1 + $0x784] ss:$8 sm:$0xf0] %vm3_vm0, %v1482_v44  }
 0x1c9   :  { %2920 = vst.msk [vmem:[%s6371_s1 + $0x245] ss:$8 sm:$0xf] %vm3_vm0, %v1580_v46  }
 0x1ca   :  { %1893 = vrot.lane.b32.xlu1 %v4487_v45, %s3190_s21  ;;  %1884 = vrot.lane.b32.xlu0 %v4455_v42, %s3190_s21  ;;  %2921 = vst.msk [vmem:[%s6371_s1 + $0x245] ss:$8 sm:$0xf0] %vm3_vm0, %v1580_v46  }
 0x1cb   :  { %1902 = vrot.lane.b32.xlu2 %v4511_v49, %s3190_s21 }
 0x1cc   :  { %v1517_v47 = vpop.permute.xlu1 %1516   ;;  %v1508_v50 = vpop.permute.xlu0 %1507  }
 0x1cd   :  { %2899 = vst.msk [vmem:[%s6371_s1 + $0x85] ss:$8 sm:$0xf] %vm3_vm0, %v1517_v47   ;;  %v1607_v52 = vpop.permute.xlu2 %1606  }
 0x1ce   :  { %2900 = vst.msk [vmem:[%s6371_s1 + $0x85] ss:$8 sm:$0xf0] %vm3_vm0, %v1517_v47  }
 0x1cf   :  { %2896 = vst.msk [vmem:[%s6371_s1 + $0x45] ss:$8 sm:$0xf] %vm3_vm0, %v1508_v50  }
 0x1d0   :  { %2897 = vst.msk [vmem:[%s6371_s1 + $0x45] ss:$8 sm:$0xf0] %vm3_vm0, %v1508_v50  }
 0x1d1   :  { %2929 = vst.msk [vmem:[%s6371_s1 + $0x305] ss:$8 sm:$0xf] %vm3_vm0, %v1607_v52  }
 0x1d2   :  { %1920 = vrot.lane.b32.xlu1 %v4532_v51, %s3190_s21  ;;  %1911 = vrot.lane.b32.xlu0 %v4500_v48, %s3190_s21  ;;  %2930 = vst.msk [vmem:[%s6371_s1 + $0x305] ss:$8 sm:$0xf0] %vm3_vm0, %v1607_v52  }
 0x1d3   :  { %1929 = vrot.lane.b32.xlu2 %v4556_v55, %s3190_s21 }
 0x1d4   :  { %v1544_v53 = vpop.permute.xlu1 %1543   ;;  %v1535_v56 = vpop.permute.xlu0 %1534  }
 0x1d5   :  { %2908 = vst.msk [vmem:[%s6371_s1 + $0x145] ss:$8 sm:$0xf] %vm3_vm0, %v1544_v53   ;;  %v1634_v57 = vpop.permute.xlu2 %1633  }
 0x1d6   :  { %2909 = vst.msk [vmem:[%s6371_s1 + $0x145] ss:$8 sm:$0xf0] %vm3_vm0, %v1544_v53  }
 0x1d7   :  { %2905 = vst.msk [vmem:[%s6371_s1 + $0x105] ss:$8 sm:$0xf] %vm3_vm0, %v1535_v56  }
 0x1d8   :  { %2906 = vst.msk [vmem:[%s6371_s1 + $0x105] ss:$8 sm:$0xf0] %vm3_vm0, %v1535_v56  }
 0x1d9   :  { %2938 = vst.msk [vmem:[%s6371_s1 + $0x3c5] ss:$8 sm:$0xf] %vm3_vm0, %v1634_v57  }
 0x1da   :  { %1947 = vrot.lane.b32.xlu1 %v4577_v1, %s3190_s21  ;;  %1938 = vrot.lane.b32.xlu0 %v4545_v54, %s3190_s21  ;;  %2939 = vst.msk [vmem:[%s6371_s1 + $0x3c5] ss:$8 sm:$0xf0] %vm3_vm0, %v1634_v57  }
 0x1db   :  { %1956 = vrot.lane.b32.xlu2 %v4601_v3, %s3190_s21 }
 0x1dc   :  { %v1571_v0 = vpop.permute.xlu1 %1570   ;;  %v1562_v58 = vpop.permute.xlu0 %1561  }
 0x1dd   :  { %2917 = vst.msk [vmem:[%s6371_s1 + $0x205] ss:$8 sm:$0xf] %vm3_vm0, %v1571_v0   ;;  %v1661_v7 = vpop.permute.xlu2 %1660  }
 0x1de   :  { %2918 = vst.msk [vmem:[%s6371_s1 + $0x205] ss:$8 sm:$0xf0] %vm3_vm0, %v1571_v0  }
 0x1df   :  { %2914 = vst.msk [vmem:[%s6371_s1 + $0x1c5] ss:$8 sm:$0xf] %vm3_vm0, %v1562_v58  }
 0x1e0   :  { %2915 = vst.msk [vmem:[%s6371_s1 + $0x1c5] ss:$8 sm:$0xf0] %vm3_vm0, %v1562_v58  }
 0x1e1   :  { %2947 = vst.msk [vmem:[%s6371_s1 + $0x485] ss:$8 sm:$0xf] %vm3_vm0, %v1661_v7  }
 0x1e2   :  { %1974 = vrot.lane.b32.xlu1 %v4622_v6, %s3190_s21  ;;  %1965 = vrot.lane.b32.xlu0 %v4590_v2, %s3190_s21  ;;  %2948 = vst.msk [vmem:[%s6371_s1 + $0x485] ss:$8 sm:$0xf0] %vm3_vm0, %v1661_v7  }
 0x1e3   :  { %1983 = vrot.lane.b32.xlu2 %v4646_v10, %s3190_s21 }
 0x1e4   :  { %v1598_v8 = vpop.permute.xlu1 %1597   ;;  %v1589_v11 = vpop.permute.xlu0 %1588  }
 0x1e5   :  { %2926 = vst.msk [vmem:[%s6371_s1 + $0x2c5] ss:$8 sm:$0xf] %vm3_vm0, %v1598_v8   ;;  %v1688_v13 = vpop.permute.xlu2 %1687  }
 0x1e6   :  { %2927 = vst.msk [vmem:[%s6371_s1 + $0x2c5] ss:$8 sm:$0xf0] %vm3_vm0, %v1598_v8  }
 0x1e7   :  { %2923 = vst.msk [vmem:[%s6371_s1 + $0x285] ss:$8 sm:$0xf] %vm3_vm0, %v1589_v11  }
 0x1e8   :  { %2924 = vst.msk [vmem:[%s6371_s1 + $0x285] ss:$8 sm:$0xf0] %vm3_vm0, %v1589_v11  }
 0x1e9   :  { %2956 = vst.msk [vmem:[%s6371_s1 + $0x545] ss:$8 sm:$0xf] %vm3_vm0, %v1688_v13  }
 0x1ea   :  { %2001 = vrot.lane.b32.xlu1 %v4667_v12, %s3190_s21  ;;  %1992 = vrot.lane.b32.xlu0 %v4635_v9, %s3190_s21  ;;  %2957 = vst.msk [vmem:[%s6371_s1 + $0x545] ss:$8 sm:$0xf0] %vm3_vm0, %v1688_v13  }
 0x1eb   :  { %2010 = vrot.lane.b32.xlu2 %v4691_v16, %s3190_s21 }
 0x1ec   :  { %v1625_v14 = vpop.permute.xlu1 %1624   ;;  %v1616_v17 = vpop.permute.xlu0 %1615  }
 0x1ed   :  { %2935 = vst.msk [vmem:[%s6371_s1 + $0x385] ss:$8 sm:$0xf] %vm3_vm0, %v1625_v14   ;;  %v1715_v19 = vpop.permute.xlu2 %1714  }
 0x1ee   :  { %2936 = vst.msk [vmem:[%s6371_s1 + $0x385] ss:$8 sm:$0xf0] %vm3_vm0, %v1625_v14  }
 0x1ef   :  { %2932 = vst.msk [vmem:[%s6371_s1 + $0x345] ss:$8 sm:$0xf] %vm3_vm0, %v1616_v17  }
 0x1f0   :  { %2933 = vst.msk [vmem:[%s6371_s1 + $0x345] ss:$8 sm:$0xf0] %vm3_vm0, %v1616_v17  }
 0x1f1   :  { %2965 = vst.msk [vmem:[%s6371_s1 + $0x605] ss:$8 sm:$0xf] %vm3_vm0, %v1715_v19  }
 0x1f2   :  { %2028 = vrot.lane.b32.xlu1 %v4712_v18, %s3190_s21  ;;  %2019 = vrot.lane.b32.xlu0 %v4680_v15, %s3190_s21  ;;  %2966 = vst.msk [vmem:[%s6371_s1 + $0x605] ss:$8 sm:$0xf0] %vm3_vm0, %v1715_v19  }
 0x1f3   :  { %2037 = vrot.lane.b32.xlu2 %v4736_v22, %s3190_s21 }
 0x1f4   :  { %v1652_v20 = vpop.permute.xlu1 %1651   ;;  %v1643_v23 = vpop.permute.xlu0 %1642  }
 0x1f5   :  { %2944 = vst.msk [vmem:[%s6371_s1 + $0x445] ss:$8 sm:$0xf] %vm3_vm0, %v1652_v20   ;;  %v1742_v25 = vpop.permute.xlu2 %1741  }
 0x1f6   :  { %2945 = vst.msk [vmem:[%s6371_s1 + $0x445] ss:$8 sm:$0xf0] %vm3_vm0, %v1652_v20  }
 0x1f7   :  { %2941 = vst.msk [vmem:[%s6371_s1 + $0x405] ss:$8 sm:$0xf] %vm3_vm0, %v1643_v23  }
 0x1f8   :  { %2942 = vst.msk [vmem:[%s6371_s1 + $0x405] ss:$8 sm:$0xf0] %vm3_vm0, %v1643_v23  }
 0x1f9   :  { %2974 = vst.msk [vmem:[%s6371_s1 + $0x6c5] ss:$8 sm:$0xf] %vm3_vm0, %v1742_v25  }
 0x1fa   :  { %2055 = vrot.lane.b32.xlu1 %v4757_v24, %s3190_s21  ;;  %2046 = vrot.lane.b32.xlu0 %v4725_v21, %s3190_s21  ;;  %2975 = vst.msk [vmem:[%s6371_s1 + $0x6c5] ss:$8 sm:$0xf0] %vm3_vm0, %v1742_v25  }
 0x1fb   :  { %2064 = vrot.lane.b32.xlu2 %v4776_v27, %s3190_s21 }
 0x1fc   :  { %v1679_v26 = vpop.permute.xlu1 %1678   ;;  %v1670_v28 = vpop.permute.xlu0 %1669  }
 0x1fd   :  { %2953 = vst.msk [vmem:[%s6371_s1 + $0x505] ss:$8 sm:$0xf] %vm3_vm0, %v1679_v26   ;;  %v1769_v31 = vpop.permute.xlu2 %1768  }
 0x1fe   :  { %2954 = vst.msk [vmem:[%s6371_s1 + $0x505] ss:$8 sm:$0xf0] %vm3_vm0, %v1679_v26  }
 0x1ff   :  { %2950 = vst.msk [vmem:[%s6371_s1 + $0x4c5] ss:$8 sm:$0xf] %vm3_vm0, %v1670_v28  }
 0x200   :  { %2951 = vst.msk [vmem:[%s6371_s1 + $0x4c5] ss:$8 sm:$0xf0] %vm3_vm0, %v1670_v28  }
 0x201   :  { %2983 = vst.msk [vmem:[%s6371_s1 + $0x785] ss:$8 sm:$0xf] %vm3_vm0, %v1769_v31  }
 0x202   :  { %2081 = vrot.lane.b32.xlu1 %v4797_v29, %s3191_s15  ;;  %2072 = vrot.lane.b32.xlu0 %v4317_v30, %s3191_s15  ;;  %2984 = vst.msk [vmem:[%s6371_s1 + $0x785] ss:$8 sm:$0xf0] %vm3_vm0, %v1769_v31   ;;  %v2_v31 = vld [vmem:[%s6370_s0] sm:$0xff]  }
 0x203   :  { %2090 = vrot.lane.b32.xlu2 %v4336_v60, %s3191_s15  ;;  %4 = vst.msk [vmem:[%s6371_s1] ss:$16 sm:$0x3] %vm3_vm0, %v2_v31  }
 0x204   :  { %v1706_v30 = vpop.permute.xlu1 %1705   ;;  %v1697_v29 = vpop.permute.xlu0 %1696   ;;  %5 = vst.msk [vmem:[%s6371_s1] ss:$16 sm:$0xc] %vm3_vm0, %v2_v31  }
 0x205   :  { %2962 = vst.msk [vmem:[%s6371_s1 + $0x5c5] ss:$8 sm:$0xf] %vm3_vm0, %v1706_v30   ;;  %v1795_v60 = vpop.permute.xlu2 %1794  }
 0x206   :  { %2963 = vst.msk [vmem:[%s6371_s1 + $0x5c5] ss:$8 sm:$0xf0] %vm3_vm0, %v1706_v30  }
 0x207   :  { %2959 = vst.msk [vmem:[%s6371_s1 + $0x585] ss:$8 sm:$0xf] %vm3_vm0, %v1697_v29  }
 0x208   :  { %2960 = vst.msk [vmem:[%s6371_s1 + $0x585] ss:$8 sm:$0xf0] %vm3_vm0, %v1697_v29  }
 0x209   :  { %2991 = vst.msk [vmem:[%s6371_s1 + $0x46] ss:$8 sm:$0xf] %vm3_vm0, %v1795_v60  }
 0x20a   :  { %2108 = vrot.lane.b32.xlu1 %v4376_v32, %s3191_s15  ;;  %2099 = vrot.lane.b32.xlu0 %v4357_v4, %s3191_s15  ;;  %2992 = vst.msk [vmem:[%s6371_s1 + $0x46] ss:$8 sm:$0xf0] %vm3_vm0, %v1795_v60   ;;  %v2358_v60 = vld [vmem:[%s6370_s0 + $0x8] sm:$0xff]  }
 0x20b   :  { %2117 = vrot.lane.b32.xlu2 %v4846_v33, %s3191_s15  ;;  %6 = vst.msk [vmem:[%s6371_s1] ss:$16 sm:$0x30] %vm3_vm0, %v2_v31  }
 0x20c   :  { %v1733_v4 = vpop.permute.xlu1 %1732   ;;  %v1724_v32 = vpop.permute.xlu0 %1723   ;;  %7 = vst.msk [vmem:[%s6371_s1] ss:$16 sm:$0xc0] %vm3_vm0, %v2_v31  }
 0x20d   :  { %2971 = vst.msk [vmem:[%s6371_s1 + $0x685] ss:$8 sm:$0xf] %vm3_vm0, %v1733_v4   ;;  %v1822_v59 = vpop.permute.xlu2 %1821  }
 0x20e   :  { %2972 = vst.msk [vmem:[%s6371_s1 + $0x685] ss:$8 sm:$0xf0] %vm3_vm0, %v1733_v4  }
 0x20f   :  { %2968 = vst.msk [vmem:[%s6371_s1 + $0x645] ss:$8 sm:$0xf] %vm3_vm0, %v1724_v32  }
 0x210   :  { %2969 = vst.msk [vmem:[%s6371_s1 + $0x645] ss:$8 sm:$0xf0] %vm3_vm0, %v1724_v32  }
 0x211   :  { %3000 = vst.msk [vmem:[%s6371_s1 + $0x106] ss:$8 sm:$0xf] %vm3_vm0, %v1822_v59  }
 0x212   :  { %2135 = vrot.lane.b32.xlu1 %v4421_v37, %s3191_s15  ;;  %2126 = vrot.lane.b32.xlu0 %v4397_v5, %s3191_s15  ;;  %3001 = vst.msk [vmem:[%s6371_s1 + $0x106] ss:$8 sm:$0xf0] %vm3_vm0, %v1822_v59   ;;  %v2363_v59 = vld [vmem:[%s6370_s0 + $0x10] sm:$0xff]  }
 0x213   :  { %2144 = vrot.lane.b32.xlu2 %v4410_v36, %s3191_s15  ;;  %2359 = vst.msk [vmem:[%s6371_s1 + $0x8] ss:$16 sm:$0x3] %vm3_vm0, %v2358_v60  }
 0x214   :  { %v1760_v5 = vpop.permute.xlu1 %1759   ;;  %v1751_v37 = vpop.permute.xlu0 %1750   ;;  %2360 = vst.msk [vmem:[%s6371_s1 + $0x8] ss:$16 sm:$0xc] %vm3_vm0, %v2358_v60  }
 0x215   :  { %2980 = vst.msk [vmem:[%s6371_s1 + $0x745] ss:$8 sm:$0xf] %vm3_vm0, %v1760_v5   ;;  %v1849_v36 = vpop.permute.xlu2 %1848  }
 0x216   :  { %2981 = vst.msk [vmem:[%s6371_s1 + $0x745] ss:$8 sm:$0xf0] %vm3_vm0, %v1760_v5  }
 0x217   :  { %2977 = vst.msk [vmem:[%s6371_s1 + $0x705] ss:$8 sm:$0xf] %vm3_vm0, %v1751_v37  }
 0x218   :  { %2978 = vst.msk [vmem:[%s6371_s1 + $0x705] ss:$8 sm:$0xf0] %vm3_vm0, %v1751_v37  }
 0x219   :  { %3009 = vst.msk [vmem:[%s6371_s1 + $0x1c6] ss:$8 sm:$0xf] %vm3_vm0, %v1849_v36  }
 0x21a   :  { %2162 = vrot.lane.b32.xlu1 %v4466_v43, %s3191_s15  ;;  %2153 = vrot.lane.b32.xlu0 %v4442_v39, %s3191_s15  ;;  %3010 = vst.msk [vmem:[%s6371_s1 + $0x1c6] ss:$8 sm:$0xf0] %vm3_vm0, %v1849_v36   ;;  %v2368_v36 = vld [vmem:[%s6370_s0 + $0x18] sm:$0xff]  }
 0x21b   :  { %2171 = vrot.lane.b32.xlu2 %v4455_v42, %s3191_s15  ;;  %2361 = vst.msk [vmem:[%s6371_s1 + $0x8] ss:$16 sm:$0x30] %vm3_vm0, %v2358_v60  }
 0x21c   :  { %v1786_v39 = vpop.permute.xlu1 %1785   ;;  %v1778_v43 = vpop.permute.xlu0 %1777   ;;  %2362 = vst.msk [vmem:[%s6371_s1 + $0x8] ss:$16 sm:$0xc0] %vm3_vm0, %v2358_v60  }
 0x21d   :  { %2988 = vst.msk [vmem:[%s6371_s1 + $0x6] ss:$8 sm:$0xf] %vm3_vm0, %v1786_v39   ;;  %v1876_v42 = vpop.permute.xlu2 %1875  }
 0x21e   :  { %2989 = vst.msk [vmem:[%s6371_s1 + $0x6] ss:$8 sm:$0xf0] %vm3_vm0, %v1786_v39  }
 0x21f   :  { %2986 = vst.msk [vmem:[%s6371_s1 + $0x7c5] ss:$8 sm:$0xf] %vm3_vm0, %v1778_v43  }
 0x220   :  { %2987 = vst.msk [vmem:[%s6371_s1 + $0x7c5] ss:$8 sm:$0xf0] %vm3_vm0, %v1778_v43  }
 0x221   :  { %3018 = vst.msk [vmem:[%s6371_s1 + $0x286] ss:$8 sm:$0xf] %vm3_vm0, %v1876_v42  }
 0x222   :  { %2189 = vrot.lane.b32.xlu1 %v4511_v49, %s3191_s15  ;;  %2180 = vrot.lane.b32.xlu0 %v4487_v45, %s3191_s15  ;;  %3019 = vst.msk [vmem:[%s6371_s1 + $0x286] ss:$8 sm:$0xf0] %vm3_vm0, %v1876_v42   ;;  %v2373_v42 = vld [vmem:[%s6370_s0 + $0x20] sm:$0xff]  }
 0x223   :  { %2198 = vrot.lane.b32.xlu2 %v4500_v48, %s3191_s15  ;;  %2364 = vst.msk [vmem:[%s6371_s1 + $0x80] ss:$16 sm:$0x3] %vm3_vm0, %v2363_v59  }
 0x224   :  { %v1813_v45 = vpop.permute.xlu1 %1812   ;;  %v1804_v49 = vpop.permute.xlu0 %1803   ;;  %2365 = vst.msk [vmem:[%s6371_s1 + $0x80] ss:$16 sm:$0xc] %vm3_vm0, %v2363_v59  }
 0x225   :  { %2997 = vst.msk [vmem:[%s6371_s1 + $0xc6] ss:$8 sm:$0xf] %vm3_vm0, %v1813_v45   ;;  %v1903_v48 = vpop.permute.xlu2 %1902  }
 0x226   :  { %2998 = vst.msk [vmem:[%s6371_s1 + $0xc6] ss:$8 sm:$0xf0] %vm3_vm0, %v1813_v45   ;;  %v2378_v45 = vld [vmem:[%s6370_s0 + $0x28] sm:$0xff]  }
 0x227   :  { %2994 = vst.msk [vmem:[%s6371_s1 + $0x86] ss:$8 sm:$0xf] %vm3_vm0, %v1804_v49  }
 0x228   :  { %2995 = vst.msk [vmem:[%s6371_s1 + $0x86] ss:$8 sm:$0xf0] %vm3_vm0, %v1804_v49   ;;  %v2383_v49 = vld [vmem:[%s6370_s0 + $0x30] sm:$0xff]  }
 0x229   :  { %3027 = vst.msk [vmem:[%s6371_s1 + $0x346] ss:$8 sm:$0xf] %vm3_vm0, %v1903_v48  }
 0x22a   :  { %2216 = vrot.lane.b32.xlu1 %v4556_v55, %s3191_s15  ;;  %2207 = vrot.lane.b32.xlu0 %v4532_v51, %s3191_s15  ;;  %3028 = vst.msk [vmem:[%s6371_s1 + $0x346] ss:$8 sm:$0xf0] %vm3_vm0, %v1903_v48   ;;  %v2388_v48 = vld [vmem:[%s6370_s0 + $0x38] sm:$0xff]  }
 0x22b   :  { %2225 = vrot.lane.b32.xlu2 %v4545_v54, %s3191_s15  ;;  %2366 = vst.msk [vmem:[%s6371_s1 + $0x80] ss:$16 sm:$0x30] %vm3_vm0, %v2363_v59  }
 0x22c   :  { %v1840_v51 = vpop.permute.xlu1 %1839   ;;  %v1831_v55 = vpop.permute.xlu0 %1830   ;;  %2367 = vst.msk [vmem:[%s6371_s1 + $0x80] ss:$16 sm:$0xc0] %vm3_vm0, %v2363_v59  }
 0x22d   :  { %3006 = vst.msk [vmem:[%s6371_s1 + $0x186] ss:$8 sm:$0xf] %vm3_vm0, %v1840_v51   ;;  %v1930_v54 = vpop.permute.xlu2 %1929  }
 0x22e   :  { %3007 = vst.msk [vmem:[%s6371_s1 + $0x186] ss:$8 sm:$0xf0] %vm3_vm0, %v1840_v51   ;;  %v2393_v51 = vld [vmem:[%s6370_s0 + $0x40] sm:$0xff]  }
 0x22f   :  { %3003 = vst.msk [vmem:[%s6371_s1 + $0x146] ss:$8 sm:$0xf] %vm3_vm0, %v1831_v55  }
 0x230   :  { %3004 = vst.msk [vmem:[%s6371_s1 + $0x146] ss:$8 sm:$0xf0] %vm3_vm0, %v1831_v55   ;;  %v2398_v55 = vld [vmem:[%s6370_s0 + $0x48] sm:$0xff]  }
 0x231   :  { %3036 = vst.msk [vmem:[%s6371_s1 + $0x406] ss:$8 sm:$0xf] %vm3_vm0, %v1930_v54  }
 0x232   :  { %2243 = vrot.lane.b32.xlu1 %v4601_v3, %s3191_s15  ;;  %2234 = vrot.lane.b32.xlu0 %v4577_v1, %s3191_s15  ;;  %3037 = vst.msk [vmem:[%s6371_s1 + $0x406] ss:$8 sm:$0xf0] %vm3_vm0, %v1930_v54   ;;  %v2403_v54 = vld [vmem:[%s6370_s0 + $0x50] sm:$0xff]  }
 0x233   :  { %2252 = vrot.lane.b32.xlu2 %v4590_v2, %s3191_s15  ;;  %2369 = vst.msk [vmem:[%s6371_s1 + $0x88] ss:$16 sm:$0x3] %vm3_vm0, %v2368_v36  }
 0x234   :  { %v1867_v1 = vpop.permute.xlu1 %1866   ;;  %v1858_v3 = vpop.permute.xlu0 %1857   ;;  %2370 = vst.msk [vmem:[%s6371_s1 + $0x88] ss:$16 sm:$0xc] %vm3_vm0, %v2368_v36  }
 0x235   :  { %3015 = vst.msk [vmem:[%s6371_s1 + $0x246] ss:$8 sm:$0xf] %vm3_vm0, %v1867_v1   ;;  %v1957_v2 = vpop.permute.xlu2 %1956  }
 0x236   :  { %3016 = vst.msk [vmem:[%s6371_s1 + $0x246] ss:$8 sm:$0xf0] %vm3_vm0, %v1867_v1   ;;  %v2408_v1 = vld [vmem:[%s6370_s0 + $0x58] sm:$0xff]  }
 0x237   :  { %3012 = vst.msk [vmem:[%s6371_s1 + $0x206] ss:$8 sm:$0xf] %vm3_vm0, %v1858_v3  }
 0x238   :  { %3013 = vst.msk [vmem:[%s6371_s1 + $0x206] ss:$8 sm:$0xf0] %vm3_vm0, %v1858_v3   ;;  %v2413_v3 = vld [vmem:[%s6370_s0 + $0x60] sm:$0xff]  }
 0x239   :  { %3045 = vst.msk [vmem:[%s6371_s1 + $0x4c6] ss:$8 sm:$0xf] %vm3_vm0, %v1957_v2  }
 0x23a   :  { %2270 = vrot.lane.b32.xlu1 %v4646_v10, %s3191_s15  ;;  %2261 = vrot.lane.b32.xlu0 %v4622_v6, %s3191_s15  ;;  %3046 = vst.msk [vmem:[%s6371_s1 + $0x4c6] ss:$8 sm:$0xf0] %vm3_vm0, %v1957_v2   ;;  %v2418_v2 = vld [vmem:[%s6370_s0 + $0x68] sm:$0xff]  }
 0x23b   :  { %2279 = vrot.lane.b32.xlu2 %v4635_v9, %s3191_s15  ;;  %2371 = vst.msk [vmem:[%s6371_s1 + $0x88] ss:$16 sm:$0x30] %vm3_vm0, %v2368_v36  }
 0x23c   :  { %v1894_v6 = vpop.permute.xlu1 %1893   ;;  %v1885_v10 = vpop.permute.xlu0 %1884   ;;  %2372 = vst.msk [vmem:[%s6371_s1 + $0x88] ss:$16 sm:$0xc0] %vm3_vm0, %v2368_v36  }
 0x23d   :  { %3024 = vst.msk [vmem:[%s6371_s1 + $0x306] ss:$8 sm:$0xf] %vm3_vm0, %v1894_v6   ;;  %v1984_v9 = vpop.permute.xlu2 %1983  }
 0x23e   :  { %3025 = vst.msk [vmem:[%s6371_s1 + $0x306] ss:$8 sm:$0xf0] %vm3_vm0, %v1894_v6   ;;  %v2423_v6 = vld [vmem:[%s6370_s0 + $0x70] sm:$0xff]  }
 0x23f   :  { %3021 = vst.msk [vmem:[%s6371_s1 + $0x2c6] ss:$8 sm:$0xf] %vm3_vm0, %v1885_v10  }
 0x240   :  { %3022 = vst.msk [vmem:[%s6371_s1 + $0x2c6] ss:$8 sm:$0xf0] %vm3_vm0, %v1885_v10   ;;  %v2428_v10 = vld [vmem:[%s6370_s0 + $0x78] sm:$0xff]  }
 0x241   :  { %3054 = vst.msk [vmem:[%s6371_s1 + $0x586] ss:$8 sm:$0xf] %vm3_vm0, %v1984_v9  }
 0x242   :  { %2297 = vrot.lane.b32.xlu1 %v4691_v16, %s3191_s15  ;;  %2288 = vrot.lane.b32.xlu0 %v4667_v12, %s3191_s15  ;;  %3055 = vst.msk [vmem:[%s6371_s1 + $0x586] ss:$8 sm:$0xf0] %vm3_vm0, %v1984_v9   ;;  %v2433_v9 = vld [vmem:[%s6370_s0 + $0x80] sm:$0xff]  }
 0x243   :  { %2306 = vrot.lane.b32.xlu2 %v4680_v15, %s3191_s15  ;;  %2374 = vst.msk [vmem:[%s6371_s1 + $0x100] ss:$16 sm:$0x3] %vm3_vm0, %v2373_v42  }
 0x244   :  { %v1921_v12 = vpop.permute.xlu1 %1920   ;;  %v1912_v16 = vpop.permute.xlu0 %1911   ;;  %2375 = vst.msk [vmem:[%s6371_s1 + $0x100] ss:$16 sm:$0xc] %vm3_vm0, %v2373_v42  }
 0x245   :  { %3033 = vst.msk [vmem:[%s6371_s1 + $0x3c6] ss:$8 sm:$0xf] %vm3_vm0, %v1921_v12   ;;  %v2011_v15 = vpop.permute.xlu2 %2010  }
 0x246   :  { %3034 = vst.msk [vmem:[%s6371_s1 + $0x3c6] ss:$8 sm:$0xf0] %vm3_vm0, %v1921_v12   ;;  %v2438_v12 = vld [vmem:[%s6370_s0 + $0x88] sm:$0xff]  }
 0x247   :  { %3030 = vst.msk [vmem:[%s6371_s1 + $0x386] ss:$8 sm:$0xf] %vm3_vm0, %v1912_v16  }
 0x248   :  { %3031 = vst.msk [vmem:[%s6371_s1 + $0x386] ss:$8 sm:$0xf0] %vm3_vm0, %v1912_v16   ;;  %v2443_v16 = vld [vmem:[%s6370_s0 + $0x90] sm:$0xff]  }
 0x249   :  { %3063 = vst.msk [vmem:[%s6371_s1 + $0x646] ss:$8 sm:$0xf] %vm3_vm0, %v2011_v15  }
 0x24a   :  { %2324 = vrot.lane.b32.xlu1 %v4736_v22, %s3191_s15  ;;  %2315 = vrot.lane.b32.xlu0 %v4712_v18, %s3191_s15  ;;  %3064 = vst.msk [vmem:[%s6371_s1 + $0x646] ss:$8 sm:$0xf0] %vm3_vm0, %v2011_v15   ;;  %v2448_v15 = vld [vmem:[%s6370_s0 + $0x98] sm:$0xff]  }
 0x24b   :  { %2333 = vrot.lane.b32.xlu2 %v4725_v21, %s3191_s15  ;;  %2376 = vst.msk [vmem:[%s6371_s1 + $0x100] ss:$16 sm:$0x30] %vm3_vm0, %v2373_v42  }
 0x24c   :  { %v1948_v18 = vpop.permute.xlu1 %1947   ;;  %v1939_v22 = vpop.permute.xlu0 %1938   ;;  %2377 = vst.msk [vmem:[%s6371_s1 + $0x100] ss:$16 sm:$0xc0] %vm3_vm0, %v2373_v42  }
 0x24d   :  { %3042 = vst.msk [vmem:[%s6371_s1 + $0x486] ss:$8 sm:$0xf] %vm3_vm0, %v1948_v18   ;;  %v2038_v21 = vpop.permute.xlu2 %2037  }
 0x24e   :  { %3043 = vst.msk [vmem:[%s6371_s1 + $0x486] ss:$8 sm:$0xf0] %vm3_vm0, %v1948_v18   ;;  %v2453_v18 = vld [vmem:[%s6370_s0 + $0xa0] sm:$0xff]  }
 0x24f   :  { %3039 = vst.msk [vmem:[%s6371_s1 + $0x446] ss:$8 sm:$0xf] %vm3_vm0, %v1939_v22  }
 0x250   :  { %3040 = vst.msk [vmem:[%s6371_s1 + $0x446] ss:$8 sm:$0xf0] %vm3_vm0, %v1939_v22   ;;  %v2458_v22 = vld [vmem:[%s6370_s0 + $0xa8] sm:$0xff]  }
 0x251   :  { %3072 = vst.msk [vmem:[%s6371_s1 + $0x706] ss:$8 sm:$0xf] %vm3_vm0, %v2038_v21  }
 0x252   :  { %2351 = vrot.lane.b32.xlu1 %v4776_v27, %s3191_s15  ;;  %2342 = vrot.lane.b32.xlu0 %v4757_v24, %s3191_s15  ;;  %3073 = vst.msk [vmem:[%s6371_s1 + $0x706] ss:$8 sm:$0xf0] %vm3_vm0, %v2038_v21   ;;  %v2463_v21 = vld [vmem:[%s6370_s0 + $0xb0] sm:$0xff]  }
 0x253   :  { %2379 = vst.msk [vmem:[%s6371_s1 + $0x108] ss:$16 sm:$0x3] %vm3_vm0, %v2378_v45  }
 0x254   :  { %v1975_v24 = vpop.permute.xlu1 %1974   ;;  %v1966_v27 = vpop.permute.xlu0 %1965   ;;  %2380 = vst.msk [vmem:[%s6371_s1 + $0x108] ss:$16 sm:$0xc] %vm3_vm0, %v2378_v45  }
 0x255   :  { %3051 = vst.msk [vmem:[%s6371_s1 + $0x546] ss:$8 sm:$0xf] %vm3_vm0, %v1975_v24   ;;  %v2065_v61 = vpop.permute.xlu2 %2064  }
 0x256   :  { %3052 = vst.msk [vmem:[%s6371_s1 + $0x546] ss:$8 sm:$0xf0] %vm3_vm0, %v1975_v24   ;;  %v2468_v24 = vld [vmem:[%s6370_s0 + $0xb8] sm:$0xff]  }
 0x257   :  { %3048 = vst.msk [vmem:[%s6371_s1 + $0x506] ss:$8 sm:$0xf] %vm3_vm0, %v1966_v27  }
 0x258   :  { %3049 = vst.msk [vmem:[%s6371_s1 + $0x506] ss:$8 sm:$0xf0] %vm3_vm0, %v1966_v27   ;;  %v2473_v27 = vld [vmem:[%s6370_s0 + $0xc0] sm:$0xff]  }
 0x259   :  { %3081 = vst.msk [vmem:[%s6371_s1 + $0x7c6] ss:$8 sm:$0xf] %vm3_vm0, %v2065_v61  }
 0x25a   :  { %3082 = vst.msk [vmem:[%s6371_s1 + $0x7c6] ss:$8 sm:$0xf0] %vm3_vm0, %v2065_v61   ;;  %v2478_v61 = vld [vmem:[%s6370_s0 + $0xc8] sm:$0xff]  }
 0x25b   :  { %2381 = vst.msk [vmem:[%s6371_s1 + $0x108] ss:$16 sm:$0x30] %vm3_vm0, %v2378_v45  }
 0x25c   :  { %v2002_v62 = vpop.permute.xlu1 %2001   ;;  %v1993_v63 = vpop.permute.xlu0 %1992   ;;  %2382 = vst.msk [vmem:[%s6371_s1 + $0x108] ss:$16 sm:$0xc0] %vm3_vm0, %v2378_v45  }
 0x25d   :  { %3060 = vst.msk [vmem:[%s6371_s1 + $0x606] ss:$8 sm:$0xf] %vm3_vm0, %v2002_v62   ;;  %v2091_v33 = vpop.permute.xlu2 %2090  }
 0x25e   :  { %3061 = vst.msk [vmem:[%s6371_s1 + $0x606] ss:$8 sm:$0xf0] %vm3_vm0, %v2002_v62   ;;  %v2483_v62 = vld [vmem:[%s6370_s0 + $0xd0] sm:$0xff]  }
 0x25f   :  { %3057 = vst.msk [vmem:[%s6371_s1 + $0x5c6] ss:$8 sm:$0xf] %vm3_vm0, %v1993_v63  }
 0x260   :  { %3058 = vst.msk [vmem:[%s6371_s1 + $0x5c6] ss:$8 sm:$0xf0] %vm3_vm0, %v1993_v63   ;;  %v2488_v63 = vld [vmem:[%s6370_s0 + $0xd8] sm:$0xff]  }
 0x261   :  { %3089 = vst.msk [vmem:[%s6371_s1 + $0x87] ss:$8 sm:$0xf] %vm3_vm0, %v2091_v33  }
 0x262   :  { %3090 = vst.msk [vmem:[%s6371_s1 + $0x87] ss:$8 sm:$0xf0] %vm3_vm0, %v2091_v33   ;;  %v2493_v33 = vld [vmem:[%s6370_s0 + $0xe0] sm:$0xff]  }
 0x263   :  { %2384 = vst.msk [vmem:[%s6371_s1 + $0x180] ss:$16 sm:$0x3] %vm3_vm0, %v2383_v49  }
 0x264   :  { %v2029_v34 = vpop.permute.xlu1 %2028   ;;  %v2020_v35 = vpop.permute.xlu0 %2019   ;;  %2385 = vst.msk [vmem:[%s6371_s1 + $0x180] ss:$16 sm:$0xc] %vm3_vm0, %v2383_v49  }
 0x265   :  { %3069 = vst.msk [vmem:[%s6371_s1 + $0x6c6] ss:$8 sm:$0xf] %vm3_vm0, %v2029_v34   ;;  %v2118_v38 = vpop.permute.xlu2 %2117  }
 0x266   :  { %3070 = vst.msk [vmem:[%s6371_s1 + $0x6c6] ss:$8 sm:$0xf0] %vm3_vm0, %v2029_v34   ;;  %v2498_v34 = vld [vmem:[%s6370_s0 + $0xe8] sm:$0xff]  }
 0x267   :  { %3066 = vst.msk [vmem:[%s6371_s1 + $0x686] ss:$8 sm:$0xf] %vm3_vm0, %v2020_v35  }
 0x268   :  { %3067 = vst.msk [vmem:[%s6371_s1 + $0x686] ss:$8 sm:$0xf0] %vm3_vm0, %v2020_v35   ;;  %v2503_v35 = vld [vmem:[%s6370_s0 + $0xf0] sm:$0xff]  }
 0x269   :  { %3098 = vst.msk [vmem:[%s6371_s1 + $0x147] ss:$8 sm:$0xf] %vm3_vm0, %v2118_v38  }
 0x26a   :  { %3099 = vst.msk [vmem:[%s6371_s1 + $0x147] ss:$8 sm:$0xf0] %vm3_vm0, %v2118_v38   ;;  %v2508_v38 = vld [vmem:[%s6370_s0 + $0xf8] sm:$0xff]  }
 0x26b   :  { %2386 = vst.msk [vmem:[%s6371_s1 + $0x180] ss:$16 sm:$0x30] %vm3_vm0, %v2383_v49  }
 0x26c   :  { %v2056_v40 = vpop.permute.xlu1 %2055   ;;  %v2047_v41 = vpop.permute.xlu0 %2046   ;;  %2387 = vst.msk [vmem:[%s6371_s1 + $0x180] ss:$16 sm:$0xc0] %vm3_vm0, %v2383_v49  }
 0x26d   :  { %3078 = vst.msk [vmem:[%s6371_s1 + $0x786] ss:$8 sm:$0xf] %vm3_vm0, %v2056_v40   ;;  %v2145_v44 = vpop.permute.xlu2 %2144  }
 0x26e   :  { %3079 = vst.msk [vmem:[%s6371_s1 + $0x786] ss:$8 sm:$0xf0] %vm3_vm0, %v2056_v40  }
 0x26f   :  { %3075 = vst.msk [vmem:[%s6371_s1 + $0x746] ss:$8 sm:$0xf] %vm3_vm0, %v2047_v41  }
 0x270   :  { %3076 = vst.msk [vmem:[%s6371_s1 + $0x746] ss:$8 sm:$0xf0] %vm3_vm0, %v2047_v41  }
 0x271   :  { %3107 = vst.msk [vmem:[%s6371_s1 + $0x207] ss:$8 sm:$0xf] %vm3_vm0, %v2145_v44  }
 0x272   :  { %3108 = vst.msk [vmem:[%s6371_s1 + $0x207] ss:$8 sm:$0xf0] %vm3_vm0, %v2145_v44  }
 0x273   :  { %2389 = vst.msk [vmem:[%s6371_s1 + $0x188] ss:$16 sm:$0x3] %vm3_vm0, %v2388_v48  }
 0x274   :  { %v2082_v46 = vpop.permute.xlu1 %2081   ;;  %v2073_v47 = vpop.permute.xlu0 %2072   ;;  %2390 = vst.msk [vmem:[%s6371_s1 + $0x188] ss:$16 sm:$0xc] %vm3_vm0, %v2388_v48  }
 0x275   :  { %3086 = vst.msk [vmem:[%s6371_s1 + $0x47] ss:$8 sm:$0xf] %vm3_vm0, %v2082_v46   ;;  %v2172_v50 = vpop.permute.xlu2 %2171  }
 0x276   :  { %3087 = vst.msk [vmem:[%s6371_s1 + $0x47] ss:$8 sm:$0xf0] %vm3_vm0, %v2082_v46  }
 0x277   :  { %3083 = vst.msk [vmem:[%s6371_s1 + $0x7] ss:$8 sm:$0xf] %vm3_vm0, %v2073_v47  }
 0x278   :  { %3084 = vst.msk [vmem:[%s6371_s1 + $0x7] ss:$8 sm:$0xf0] %vm3_vm0, %v2073_v47  }
 0x279   :  { %3116 = vst.msk [vmem:[%s6371_s1 + $0x2c7] ss:$8 sm:$0xf] %vm3_vm0, %v2172_v50  }
 0x27a   :  { %3117 = vst.msk [vmem:[%s6371_s1 + $0x2c7] ss:$8 sm:$0xf0] %vm3_vm0, %v2172_v50  }
 0x27b   :  { %2391 = vst.msk [vmem:[%s6371_s1 + $0x188] ss:$16 sm:$0x30] %vm3_vm0, %v2388_v48  }
 0x27c   :  { %v2109_v52 = vpop.permute.xlu1 %2108   ;;  %v2100_v53 = vpop.permute.xlu0 %2099   ;;  %2392 = vst.msk [vmem:[%s6371_s1 + $0x188] ss:$16 sm:$0xc0] %vm3_vm0, %v2388_v48  }
 0x27d   :  { %3095 = vst.msk [vmem:[%s6371_s1 + $0x107] ss:$8 sm:$0xf] %vm3_vm0, %v2109_v52   ;;  %v2199_v56 = vpop.permute.xlu2 %2198  }
 0x27e   :  { %3096 = vst.msk [vmem:[%s6371_s1 + $0x107] ss:$8 sm:$0xf0] %vm3_vm0, %v2109_v52  }
 0x27f   :  { %3092 = vst.msk [vmem:[%s6371_s1 + $0xc7] ss:$8 sm:$0xf] %vm3_vm0, %v2100_v53  }
 0x280   :  { %3093 = vst.msk [vmem:[%s6371_s1 + $0xc7] ss:$8 sm:$0xf0] %vm3_vm0, %v2100_v53  }
 0x281   :  { %3125 = vst.msk [vmem:[%s6371_s1 + $0x387] ss:$8 sm:$0xf] %vm3_vm0, %v2199_v56  }
 0x282   :  { %3126 = vst.msk [vmem:[%s6371_s1 + $0x387] ss:$8 sm:$0xf0] %vm3_vm0, %v2199_v56  }
 0x283   :  { %2394 = vst.msk [vmem:[%s6371_s1 + $0x200] ss:$16 sm:$0x3] %vm3_vm0, %v2393_v51  }
 0x284   :  { %v2136_v57 = vpop.permute.xlu1 %2135   ;;  %v2127_v0 = vpop.permute.xlu0 %2126   ;;  %2395 = vst.msk [vmem:[%s6371_s1 + $0x200] ss:$16 sm:$0xc] %vm3_vm0, %v2393_v51  }
 0x285   :  { %3104 = vst.msk [vmem:[%s6371_s1 + $0x1c7] ss:$8 sm:$0xf] %vm3_vm0, %v2136_v57   ;;  %v2226_v58 = vpop.permute.xlu2 %2225  }
 0x286   :  { %3105 = vst.msk [vmem:[%s6371_s1 + $0x1c7] ss:$8 sm:$0xf0] %vm3_vm0, %v2136_v57  }
 0x287   :  { %3101 = vst.msk [vmem:[%s6371_s1 + $0x187] ss:$8 sm:$0xf] %vm3_vm0, %v2127_v0  }
 0x288   :  { %3102 = vst.msk [vmem:[%s6371_s1 + $0x187] ss:$8 sm:$0xf0] %vm3_vm0, %v2127_v0  }
 0x289   :  { %3134 = vst.msk [vmem:[%s6371_s1 + $0x447] ss:$8 sm:$0xf] %vm3_vm0, %v2226_v58  }
 0x28a   :  { %3135 = vst.msk [vmem:[%s6371_s1 + $0x447] ss:$8 sm:$0xf0] %vm3_vm0, %v2226_v58  }
 0x28b   :  { %2396 = vst.msk [vmem:[%s6371_s1 + $0x200] ss:$16 sm:$0x30] %vm3_vm0, %v2393_v51  }
 0x28c   :  { %v2163_v7 = vpop.permute.xlu1 %2162   ;;  %v2154_v8 = vpop.permute.xlu0 %2153   ;;  %2397 = vst.msk [vmem:[%s6371_s1 + $0x200] ss:$16 sm:$0xc0] %vm3_vm0, %v2393_v51  }
 0x28d   :  { %3113 = vst.msk [vmem:[%s6371_s1 + $0x287] ss:$8 sm:$0xf] %vm3_vm0, %v2163_v7   ;;  %v2253_v11 = vpop.permute.xlu2 %2252  }
 0x28e   :  { %3114 = vst.msk [vmem:[%s6371_s1 + $0x287] ss:$8 sm:$0xf0] %vm3_vm0, %v2163_v7  }
 0x28f   :  { %3110 = vst.msk [vmem:[%s6371_s1 + $0x247] ss:$8 sm:$0xf] %vm3_vm0, %v2154_v8  }
 0x290   :  { %3111 = vst.msk [vmem:[%s6371_s1 + $0x247] ss:$8 sm:$0xf0] %vm3_vm0, %v2154_v8  }
 0x291   :  { %3143 = vst.msk [vmem:[%s6371_s1 + $0x507] ss:$8 sm:$0xf] %vm3_vm0, %v2253_v11  }
 0x292   :  { %3144 = vst.msk [vmem:[%s6371_s1 + $0x507] ss:$8 sm:$0xf0] %vm3_vm0, %v2253_v11  }
 0x293   :  { %2399 = vst.msk [vmem:[%s6371_s1 + $0x208] ss:$16 sm:$0x3] %vm3_vm0, %v2398_v55  }
 0x294   :  { %v2190_v13 = vpop.permute.xlu1 %2189   ;;  %v2181_v14 = vpop.permute.xlu0 %2180   ;;  %2400 = vst.msk [vmem:[%s6371_s1 + $0x208] ss:$16 sm:$0xc] %vm3_vm0, %v2398_v55  }
 0x295   :  { %3122 = vst.msk [vmem:[%s6371_s1 + $0x347] ss:$8 sm:$0xf] %vm3_vm0, %v2190_v13   ;;  %v2280_v17 = vpop.permute.xlu2 %2279  }
 0x296   :  { %3123 = vst.msk [vmem:[%s6371_s1 + $0x347] ss:$8 sm:$0xf0] %vm3_vm0, %v2190_v13  }
 0x297   :  { %3119 = vst.msk [vmem:[%s6371_s1 + $0x307] ss:$8 sm:$0xf] %vm3_vm0, %v2181_v14  }
 0x298   :  { %3120 = vst.msk [vmem:[%s6371_s1 + $0x307] ss:$8 sm:$0xf0] %vm3_vm0, %v2181_v14  }
 0x299   :  { %3152 = vst.msk [vmem:[%s6371_s1 + $0x5c7] ss:$8 sm:$0xf] %vm3_vm0, %v2280_v17  }
 0x29a   :  { %3153 = vst.msk [vmem:[%s6371_s1 + $0x5c7] ss:$8 sm:$0xf0] %vm3_vm0, %v2280_v17  }
 0x29b   :  { %2401 = vst.msk [vmem:[%s6371_s1 + $0x208] ss:$16 sm:$0x30] %vm3_vm0, %v2398_v55  }
 0x29c   :  { %v2217_v19 = vpop.permute.xlu1 %2216   ;;  %v2208_v20 = vpop.permute.xlu0 %2207   ;;  %2402 = vst.msk [vmem:[%s6371_s1 + $0x208] ss:$16 sm:$0xc0] %vm3_vm0, %v2398_v55  }
 0x29d   :  { %3131 = vst.msk [vmem:[%s6371_s1 + $0x407] ss:$8 sm:$0xf] %vm3_vm0, %v2217_v19   ;;  %v2307_v23 = vpop.permute.xlu2 %2306  }
 0x29e   :  { %3132 = vst.msk [vmem:[%s6371_s1 + $0x407] ss:$8 sm:$0xf0] %vm3_vm0, %v2217_v19  }
 0x29f   :  { %3128 = vst.msk [vmem:[%s6371_s1 + $0x3c7] ss:$8 sm:$0xf] %vm3_vm0, %v2208_v20  }
 0x2a0   :  { %3129 = vst.msk [vmem:[%s6371_s1 + $0x3c7] ss:$8 sm:$0xf0] %vm3_vm0, %v2208_v20  }
 0x2a1   :  { %3161 = vst.msk [vmem:[%s6371_s1 + $0x687] ss:$8 sm:$0xf] %vm3_vm0, %v2307_v23  }
 0x2a2   :  { %3162 = vst.msk [vmem:[%s6371_s1 + $0x687] ss:$8 sm:$0xf0] %vm3_vm0, %v2307_v23  }
 0x2a3   :  { %2404 = vst.msk [vmem:[%s6371_s1 + $0x280] ss:$16 sm:$0x3] %vm3_vm0, %v2403_v54  }
 0x2a4   :  { %v2244_v25 = vpop.permute.xlu1 %2243   ;;  %v2235_v26 = vpop.permute.xlu0 %2234   ;;  %2405 = vst.msk [vmem:[%s6371_s1 + $0x280] ss:$16 sm:$0xc] %vm3_vm0, %v2403_v54  }
 0x2a5   :  { %3140 = vst.msk [vmem:[%s6371_s1 + $0x4c7] ss:$8 sm:$0xf] %vm3_vm0, %v2244_v25   ;;  %v2334_v28 = vpop.permute.xlu2 %2333  }
 0x2a6   :  { %3141 = vst.msk [vmem:[%s6371_s1 + $0x4c7] ss:$8 sm:$0xf0] %vm3_vm0, %v2244_v25  }
 0x2a7   :  { %3137 = vst.msk [vmem:[%s6371_s1 + $0x487] ss:$8 sm:$0xf] %vm3_vm0, %v2235_v26  }
 0x2a8   :  { %3138 = vst.msk [vmem:[%s6371_s1 + $0x487] ss:$8 sm:$0xf0] %vm3_vm0, %v2235_v26  }
 0x2a9   :  { %3170 = vst.msk [vmem:[%s6371_s1 + $0x747] ss:$8 sm:$0xf] %vm3_vm0, %v2334_v28  }
 0x2aa   :  { %3171 = vst.msk [vmem:[%s6371_s1 + $0x747] ss:$8 sm:$0xf0] %vm3_vm0, %v2334_v28  }
 0x2ab   :  { %2406 = vst.msk [vmem:[%s6371_s1 + $0x280] ss:$16 sm:$0x30] %vm3_vm0, %v2403_v54  }
 0x2ac   :  { %v2271_v30 = vpop.permute.xlu1 %2270   ;;  %v2262_v29 = vpop.permute.xlu0 %2261   ;;  %2407 = vst.msk [vmem:[%s6371_s1 + $0x280] ss:$16 sm:$0xc0] %vm3_vm0, %v2403_v54  }
 0x2ad   :  { %3149 = vst.msk [vmem:[%s6371_s1 + $0x587] ss:$8 sm:$0xf] %vm3_vm0, %v2271_v30  }
 0x2ae   :  { %3150 = vst.msk [vmem:[%s6371_s1 + $0x587] ss:$8 sm:$0xf0] %vm3_vm0, %v2271_v30  }
 0x2af   :  { %3146 = vst.msk [vmem:[%s6371_s1 + $0x547] ss:$8 sm:$0xf] %vm3_vm0, %v2262_v29  }
 0x2b0   :  { %3147 = vst.msk [vmem:[%s6371_s1 + $0x547] ss:$8 sm:$0xf0] %vm3_vm0, %v2262_v29  }
 0x2b1   :  { %2409 = vst.msk [vmem:[%s6371_s1 + $0x288] ss:$16 sm:$0x3] %vm3_vm0, %v2408_v1  }
 0x2b2   :  { %2410 = vst.msk [vmem:[%s6371_s1 + $0x288] ss:$16 sm:$0xc] %vm3_vm0, %v2408_v1  }
 0x2b3   :  { %2411 = vst.msk [vmem:[%s6371_s1 + $0x288] ss:$16 sm:$0x30] %vm3_vm0, %v2408_v1  }
 0x2b4   :  { %v2298_v4 = vpop.permute.xlu1 %2297   ;;  %v2289_v32 = vpop.permute.xlu0 %2288   ;;  %2412 = vst.msk [vmem:[%s6371_s1 + $0x288] ss:$16 sm:$0xc0] %vm3_vm0, %v2408_v1  }
 0x2b5   :  { %3158 = vst.msk [vmem:[%s6371_s1 + $0x647] ss:$8 sm:$0xf] %vm3_vm0, %v2298_v4  }
 0x2b6   :  { %3159 = vst.msk [vmem:[%s6371_s1 + $0x647] ss:$8 sm:$0xf0] %vm3_vm0, %v2298_v4  }
 0x2b7   :  { %3155 = vst.msk [vmem:[%s6371_s1 + $0x607] ss:$8 sm:$0xf] %vm3_vm0, %v2289_v32  }
 0x2b8   :  { %3156 = vst.msk [vmem:[%s6371_s1 + $0x607] ss:$8 sm:$0xf0] %vm3_vm0, %v2289_v32  }
 0x2b9   :  { %2414 = vst.msk [vmem:[%s6371_s1 + $0x300] ss:$16 sm:$0x3] %vm3_vm0, %v2413_v3  }
 0x2ba   :  { %2415 = vst.msk [vmem:[%s6371_s1 + $0x300] ss:$16 sm:$0xc] %vm3_vm0, %v2413_v3  }
 0x2bb   :  { %2416 = vst.msk [vmem:[%s6371_s1 + $0x300] ss:$16 sm:$0x30] %vm3_vm0, %v2413_v3  }
 0x2bc   :  { %v2325_v5 = vpop.permute.xlu1 %2324   ;;  %v2316_v37 = vpop.permute.xlu0 %2315   ;;  %2417 = vst.msk [vmem:[%s6371_s1 + $0x300] ss:$16 sm:$0xc0] %vm3_vm0, %v2413_v3  }
 0x2bd   :  { %3167 = vst.msk [vmem:[%s6371_s1 + $0x707] ss:$8 sm:$0xf] %vm3_vm0, %v2325_v5  }
 0x2be   :  { %3168 = vst.msk [vmem:[%s6371_s1 + $0x707] ss:$8 sm:$0xf0] %vm3_vm0, %v2325_v5  }
 0x2bf   :  { %3164 = vst.msk [vmem:[%s6371_s1 + $0x6c7] ss:$8 sm:$0xf] %vm3_vm0, %v2316_v37  }
 0x2c0   :  { %3165 = vst.msk [vmem:[%s6371_s1 + $0x6c7] ss:$8 sm:$0xf0] %vm3_vm0, %v2316_v37  }
 0x2c1   :  { %2419 = vst.msk [vmem:[%s6371_s1 + $0x308] ss:$16 sm:$0x3] %vm3_vm0, %v2418_v2  }
 0x2c2   :  { %2420 = vst.msk [vmem:[%s6371_s1 + $0x308] ss:$16 sm:$0xc] %vm3_vm0, %v2418_v2  }
 0x2c3   :  { %2421 = vst.msk [vmem:[%s6371_s1 + $0x308] ss:$16 sm:$0x30] %vm3_vm0, %v2418_v2  }
 0x2c4   :  { %v2352_v39 = vpop.permute.xlu1 %2351   ;;  %v2343_v43 = vpop.permute.xlu0 %2342   ;;  %2422 = vst.msk [vmem:[%s6371_s1 + $0x308] ss:$16 sm:$0xc0] %vm3_vm0, %v2418_v2  }
 0x2c5   :  { %3176 = vst.msk [vmem:[%s6371_s1 + $0x7c7] ss:$8 sm:$0xf] %vm3_vm0, %v2352_v39  }
 0x2c6   :  { %3177 = vst.msk [vmem:[%s6371_s1 + $0x7c7] ss:$8 sm:$0xf0] %vm3_vm0, %v2352_v39  }
 0x2c7   :  { %3173 = vst.msk [vmem:[%s6371_s1 + $0x787] ss:$8 sm:$0xf] %vm3_vm0, %v2343_v43  }
 0x2c8   :  { %3174 = vst.msk [vmem:[%s6371_s1 + $0x787] ss:$8 sm:$0xf0] %vm3_vm0, %v2343_v43  }
 0x2c9   :  { %2424 = vst.msk [vmem:[%s6371_s1 + $0x380] ss:$16 sm:$0x3] %vm3_vm0, %v2423_v6  }
 0x2ca   :  { %2425 = vst.msk [vmem:[%s6371_s1 + $0x380] ss:$16 sm:$0xc] %vm3_vm0, %v2423_v6  }
 0x2cb   :  { %2426 = vst.msk [vmem:[%s6371_s1 + $0x380] ss:$16 sm:$0x30] %vm3_vm0, %v2423_v6  }
 0x2cc   :  { %2427 = vst.msk [vmem:[%s6371_s1 + $0x380] ss:$16 sm:$0xc0] %vm3_vm0, %v2423_v6  }
 0x2cd   :  { %2429 = vst.msk [vmem:[%s6371_s1 + $0x388] ss:$16 sm:$0x3] %vm3_vm0, %v2428_v10  }
 0x2ce   :  { %2430 = vst.msk [vmem:[%s6371_s1 + $0x388] ss:$16 sm:$0xc] %vm3_vm0, %v2428_v10  }
 0x2cf   :  { %2431 = vst.msk [vmem:[%s6371_s1 + $0x388] ss:$16 sm:$0x30] %vm3_vm0, %v2428_v10  }
 0x2d0   :  { %2432 = vst.msk [vmem:[%s6371_s1 + $0x388] ss:$16 sm:$0xc0] %vm3_vm0, %v2428_v10  }
 0x2d1   :  { %2434 = vst.msk [vmem:[%s6371_s1 + $0x400] ss:$16 sm:$0x3] %vm3_vm0, %v2433_v9  }
 0x2d2   :  { %2435 = vst.msk [vmem:[%s6371_s1 + $0x400] ss:$16 sm:$0xc] %vm3_vm0, %v2433_v9  }
 0x2d3   :  { %2436 = vst.msk [vmem:[%s6371_s1 + $0x400] ss:$16 sm:$0x30] %vm3_vm0, %v2433_v9  }
 0x2d4   :  { %2437 = vst.msk [vmem:[%s6371_s1 + $0x400] ss:$16 sm:$0xc0] %vm3_vm0, %v2433_v9  }
 0x2d5   :  { %2439 = vst.msk [vmem:[%s6371_s1 + $0x408] ss:$16 sm:$0x3] %vm3_vm0, %v2438_v12  }
 0x2d6   :  { %2440 = vst.msk [vmem:[%s6371_s1 + $0x408] ss:$16 sm:$0xc] %vm3_vm0, %v2438_v12  }
 0x2d7   :  { %2441 = vst.msk [vmem:[%s6371_s1 + $0x408] ss:$16 sm:$0x30] %vm3_vm0, %v2438_v12  }
 0x2d8   :  { %2442 = vst.msk [vmem:[%s6371_s1 + $0x408] ss:$16 sm:$0xc0] %vm3_vm0, %v2438_v12  }
 0x2d9   :  { %2444 = vst.msk [vmem:[%s6371_s1 + $0x480] ss:$16 sm:$0x3] %vm3_vm0, %v2443_v16  }
 0x2da   :  { %2445 = vst.msk [vmem:[%s6371_s1 + $0x480] ss:$16 sm:$0xc] %vm3_vm0, %v2443_v16  }
 0x2db   :  { %2446 = vst.msk [vmem:[%s6371_s1 + $0x480] ss:$16 sm:$0x30] %vm3_vm0, %v2443_v16  }
 0x2dc   :  { %2447 = vst.msk [vmem:[%s6371_s1 + $0x480] ss:$16 sm:$0xc0] %vm3_vm0, %v2443_v16  }
 0x2dd   :  { %2449 = vst.msk [vmem:[%s6371_s1 + $0x488] ss:$16 sm:$0x3] %vm3_vm0, %v2448_v15  }
 0x2de   :  { %2450 = vst.msk [vmem:[%s6371_s1 + $0x488] ss:$16 sm:$0xc] %vm3_vm0, %v2448_v15  }
 0x2df   :  { %2451 = vst.msk [vmem:[%s6371_s1 + $0x488] ss:$16 sm:$0x30] %vm3_vm0, %v2448_v15  }
 0x2e0   :  { %2452 = vst.msk [vmem:[%s6371_s1 + $0x488] ss:$16 sm:$0xc0] %vm3_vm0, %v2448_v15  }
 0x2e1   :  { %2454 = vst.msk [vmem:[%s6371_s1 + $0x500] ss:$16 sm:$0x3] %vm3_vm0, %v2453_v18  }
 0x2e2   :  { %2455 = vst.msk [vmem:[%s6371_s1 + $0x500] ss:$16 sm:$0xc] %vm3_vm0, %v2453_v18  }
 0x2e3   :  { %2456 = vst.msk [vmem:[%s6371_s1 + $0x500] ss:$16 sm:$0x30] %vm3_vm0, %v2453_v18  }
 0x2e4   :  { %2457 = vst.msk [vmem:[%s6371_s1 + $0x500] ss:$16 sm:$0xc0] %vm3_vm0, %v2453_v18  }
 0x2e5   :  { %2459 = vst.msk [vmem:[%s6371_s1 + $0x508] ss:$16 sm:$0x3] %vm3_vm0, %v2458_v22  }
 0x2e6   :  { %2460 = vst.msk [vmem:[%s6371_s1 + $0x508] ss:$16 sm:$0xc] %vm3_vm0, %v2458_v22  }
 0x2e7   :  { %2461 = vst.msk [vmem:[%s6371_s1 + $0x508] ss:$16 sm:$0x30] %vm3_vm0, %v2458_v22  }
 0x2e8   :  { %2462 = vst.msk [vmem:[%s6371_s1 + $0x508] ss:$16 sm:$0xc0] %vm3_vm0, %v2458_v22  }
 0x2e9   :  { %2464 = vst.msk [vmem:[%s6371_s1 + $0x580] ss:$16 sm:$0x3] %vm3_vm0, %v2463_v21  }
 0x2ea   :  { %2465 = vst.msk [vmem:[%s6371_s1 + $0x580] ss:$16 sm:$0xc] %vm3_vm0, %v2463_v21  }
 0x2eb   :  { %2466 = vst.msk [vmem:[%s6371_s1 + $0x580] ss:$16 sm:$0x30] %vm3_vm0, %v2463_v21  }
 0x2ec   :  { %2467 = vst.msk [vmem:[%s6371_s1 + $0x580] ss:$16 sm:$0xc0] %vm3_vm0, %v2463_v21  }
 0x2ed   :  { %2469 = vst.msk [vmem:[%s6371_s1 + $0x588] ss:$16 sm:$0x3] %vm3_vm0, %v2468_v24  }
 0x2ee   :  { %2470 = vst.msk [vmem:[%s6371_s1 + $0x588] ss:$16 sm:$0xc] %vm3_vm0, %v2468_v24  }
 0x2ef   :  { %2471 = vst.msk [vmem:[%s6371_s1 + $0x588] ss:$16 sm:$0x30] %vm3_vm0, %v2468_v24  }
 0x2f0   :  { %2472 = vst.msk [vmem:[%s6371_s1 + $0x588] ss:$16 sm:$0xc0] %vm3_vm0, %v2468_v24  }
 0x2f1   :  { %2474 = vst.msk [vmem:[%s6371_s1 + $0x600] ss:$16 sm:$0x3] %vm3_vm0, %v2473_v27  }
 0x2f2   :  { %2475 = vst.msk [vmem:[%s6371_s1 + $0x600] ss:$16 sm:$0xc] %vm3_vm0, %v2473_v27  }
 0x2f3   :  { %2476 = vst.msk [vmem:[%s6371_s1 + $0x600] ss:$16 sm:$0x30] %vm3_vm0, %v2473_v27  }
 0x2f4   :  { %2477 = vst.msk [vmem:[%s6371_s1 + $0x600] ss:$16 sm:$0xc0] %vm3_vm0, %v2473_v27  }
 0x2f5   :  { %2479 = vst.msk [vmem:[%s6371_s1 + $0x608] ss:$16 sm:$0x3] %vm3_vm0, %v2478_v61  }
 0x2f6   :  { %2480 = vst.msk [vmem:[%s6371_s1 + $0x608] ss:$16 sm:$0xc] %vm3_vm0, %v2478_v61  }
 0x2f7   :  { %2481 = vst.msk [vmem:[%s6371_s1 + $0x608] ss:$16 sm:$0x30] %vm3_vm0, %v2478_v61  }
 0x2f8   :  { %2482 = vst.msk [vmem:[%s6371_s1 + $0x608] ss:$16 sm:$0xc0] %vm3_vm0, %v2478_v61  }
 0x2f9   :  { %2484 = vst.msk [vmem:[%s6371_s1 + $0x680] ss:$16 sm:$0x3] %vm3_vm0, %v2483_v62  }
 0x2fa   :  { %2485 = vst.msk [vmem:[%s6371_s1 + $0x680] ss:$16 sm:$0xc] %vm3_vm0, %v2483_v62  }
 0x2fb   :  { %2486 = vst.msk [vmem:[%s6371_s1 + $0x680] ss:$16 sm:$0x30] %vm3_vm0, %v2483_v62  }
 0x2fc   :  { %2487 = vst.msk [vmem:[%s6371_s1 + $0x680] ss:$16 sm:$0xc0] %vm3_vm0, %v2483_v62  }
 0x2fd   :  { %2489 = vst.msk [vmem:[%s6371_s1 + $0x688] ss:$16 sm:$0x3] %vm3_vm0, %v2488_v63  }
 0x2fe   :  { %2490 = vst.msk [vmem:[%s6371_s1 + $0x688] ss:$16 sm:$0xc] %vm3_vm0, %v2488_v63  }
 0x2ff   :  { %2491 = vst.msk [vmem:[%s6371_s1 + $0x688] ss:$16 sm:$0x30] %vm3_vm0, %v2488_v63  }
 0x300   :  { %2492 = vst.msk [vmem:[%s6371_s1 + $0x688] ss:$16 sm:$0xc0] %vm3_vm0, %v2488_v63  }
 0x301   :  { %2494 = vst.msk [vmem:[%s6371_s1 + $0x700] ss:$16 sm:$0x3] %vm3_vm0, %v2493_v33  }
 0x302   :  { %2495 = vst.msk [vmem:[%s6371_s1 + $0x700] ss:$16 sm:$0xc] %vm3_vm0, %v2493_v33  }
 0x303   :  { %2496 = vst.msk [vmem:[%s6371_s1 + $0x700] ss:$16 sm:$0x30] %vm3_vm0, %v2493_v33  }
 0x304   :  { %2497 = vst.msk [vmem:[%s6371_s1 + $0x700] ss:$16 sm:$0xc0] %vm3_vm0, %v2493_v33  }
 0x305   :  { %2499 = vst.msk [vmem:[%s6371_s1 + $0x708] ss:$16 sm:$0x3] %vm3_vm0, %v2498_v34  }
 0x306   :  { %2500 = vst.msk [vmem:[%s6371_s1 + $0x708] ss:$16 sm:$0xc] %vm3_vm0, %v2498_v34  }
 0x307   :  { %2501 = vst.msk [vmem:[%s6371_s1 + $0x708] ss:$16 sm:$0x30] %vm3_vm0, %v2498_v34  }
 0x308   :  { %2502 = vst.msk [vmem:[%s6371_s1 + $0x708] ss:$16 sm:$0xc0] %vm3_vm0, %v2498_v34  }
 0x309   :  { %2504 = vst.msk [vmem:[%s6371_s1 + $0x780] ss:$16 sm:$0x3] %vm3_vm0, %v2503_v35  }
 0x30a   :  { %2505 = vst.msk [vmem:[%s6371_s1 + $0x780] ss:$16 sm:$0xc] %vm3_vm0, %v2503_v35  }
 0x30b   :  { %2506 = vst.msk [vmem:[%s6371_s1 + $0x780] ss:$16 sm:$0x30] %vm3_vm0, %v2503_v35  }
 0x30c   :  { %2507 = vst.msk [vmem:[%s6371_s1 + $0x780] ss:$16 sm:$0xc0] %vm3_vm0, %v2503_v35  }
 0x30d   :  { %2509 = vst.msk [vmem:[%s6371_s1 + $0x788] ss:$16 sm:$0x3] %vm3_vm0, %v2508_v38  }
 0x30e   :  { %2510 = vst.msk [vmem:[%s6371_s1 + $0x788] ss:$16 sm:$0xc] %vm3_vm0, %v2508_v38  }
 0x30f   :  { %2511 = vst.msk [vmem:[%s6371_s1 + $0x788] ss:$16 sm:$0x30] %vm3_vm0, %v2508_v38  }
 0x310   :  { %2512 = vst.msk [vmem:[%s6371_s1 + $0x788] ss:$16 sm:$0xc0] %vm3_vm0, %v2508_v38  }

</bundles_post_ra>
